<compile_context>
chip_gen: v6e
topology: v6e:2x2x1
jax: 0.10.0
libtpu: 0.0.40
codegen_flags: <defaults>
</compile_context>

<pallas_src>
import functools

import jax
import jax.numpy as jnp
from jax.experimental import pallas as pl
from jax.experimental.pallas import tpu as pltpu


# ----------------------------------------------------------------------------- kernel
def _map_block_kernel(
    x_ref, q_ref,
    wk_ref, bk_ref, wv_ref, bv_ref, wp_ref, bp_ref, g_ref,
    w1_ref, b1_ref, w2p_ref, b2p_ref, w2g_ref, b2g_ref, w3_ref, b3_ref,
    out_ref,
    *, n_heads, rms_eps, tb, n_latents,
):
    N = x_ref.shape[1]
    D = x_ref.shape[2]
    K = n_latents
    Dh = D // n_heads

    # Flatten the batch tile into rows: every big matmul feeds the MXU with tb*N (resp. tb*K)
    # rows instead of N (resp. K).  Merging / splitting leading dims is a free reshape.
    x = x_ref[...].reshape(tb * N, D)          # (tb*N, D)
    q = q_ref[...]                             # (K, D), shared across the batch, scale folded in

    # --- MAPAttention k/v projections (flat, MXU-friendly matmuls, no post-slicing) ---
    k = (jnp.dot(x, wk_ref[...], preferred_element_type=jnp.float32)
         + bk_ref[...]).reshape(tb, N, D)      # (tb, N, D)
    v = (jnp.dot(x, wv_ref[...], preferred_element_type=jnp.float32)
         + bv_ref[...]).reshape(tb, N, D)      # (tb, N, D)

    # --- Per-head attention pooling, batched over the tb batch elements --------------
    # No k transpose: contract the last dims directly via a batched einsum.
    head_outs = []
    for h in range(n_heads):
        lo = h * Dh
        qh = jnp.broadcast_to(q[:, lo:lo + Dh][None], (tb, K, Dh))   # (tb, K, Dh)
        kh = k[:, :, lo:lo + Dh]                                     # (tb, N, Dh)
        vh = v[:, :, lo:lo + Dh]                                     # (tb, N, Dh)
        s = jnp.einsum('bkd,bnd->bkn', qh, kh,
                       preferred_element_type=jnp.float32)           # (tb, K, N)
        s = s - jnp.max(s, axis=-1, keepdims=True)
        e = jnp.exp(s)
        attn = e * pl.reciprocal(jnp.sum(e, axis=-1, keepdims=True), approx=True)
        head_outs.append(jnp.einsum('bkn,bnd->bkd', attn, vh,
                                    preferred_element_type=jnp.float32))   # (tb, K, Dh)
    vals = jnp.concatenate(head_outs, axis=-1).reshape(tb * K, D)    # (tb*K, D)

    latents = jnp.dot(vals, wp_ref[...], preferred_element_type=jnp.float32) + bp_ref[...]  # (tb*K, D)

    # --- RMSNorm (Voltron style: x / clamp(||x|| * D^-0.5, eps) * g) ------------------
    norm = jnp.sqrt(jnp.sum(latents * latents, axis=-1, keepdims=True)) * (D ** -0.5)
    normed = latents * pl.reciprocal(jnp.maximum(norm, rms_eps), approx=True) * g_ref[...]

    # --- MLP: Linear(D,4D) -> SwishGLU (proj/gate weights pre-split) -> Linear(4D,D) --
    h1 = jnp.dot(normed, w1_ref[...], preferred_element_type=jnp.float32) + b1_ref[...]       # (tb*K, 4D)
    projected = jnp.dot(h1, w2p_ref[...], preferred_element_type=jnp.float32) + b2p_ref[...]  # (tb*K, 4D)
    gate = jnp.dot(h1, w2g_ref[...], preferred_element_type=jnp.float32) + b2g_ref[...]       # (tb*K, 4D)
    swish = projected * (gate * jax.nn.sigmoid(gate))                                         # SwishGLU
    mlp_out = jnp.dot(swish, w3_ref[...], preferred_element_type=jnp.float32) + b3_ref[...]   # (tb*K, D)

    # Residual (post-norm MAPBlock): mlp(norm(latents)) + latents
    out_ref[...] = (mlp_out + latents).reshape(out_ref.shape)


# ----------------------------------------------------------------------------- wrapper
def _pick_batch_tile(B, N, K, D):
    """Largest divisor of B that gives ~256 latent rows per step and a modest x block."""
    target = pl.cdiv(256, max(K, 1))                  # rows of latents per grid step for the MXU
    cap = max(1, (2 << 20) // max(1, N * D * 4))      # keep double-buffered x block ~<= 4 MiB
    want = max(1, min(B, target, cap))
    for cand in range(want, 0, -1):
        if B % cand == 0:
            return cand
    return 1


def map_adapter_forward(params, x, n_heads_eff, init_embed=None, *, batch_tile=None):
    """x: (B, N, D) float32.  Returns (B, K, D), or (B, D) if n_latents == 1."""
    B, N, D = x.shape
    K = params["probe"].shape[0]
    mlp_dim = params["w1"].shape[1]
    scale = (D // n_heads_eff) ** -0.5

    probe = params["probe"].astype(jnp.float32)       # (K, D): never materialized per-batch
    if init_embed is not None:
        # TODO(synk): upstream MPI init_embed composition is ambiguous; it is added to the
        # shared probe here and must broadcast to (K, D) (per-batch init_embed not supported).
        probe = probe + jnp.asarray(init_embed, jnp.float32)
        assert probe.shape == (K, D), probe.shape

    # q depends only on the shared probe: fold the projection and the softmax scale into a
    # one-off tiny wrapper matmul so the kernel never recomputes it per grid step.  Matches
    # torch's `q @ (k.transpose(-2, -1) * scale)` numerics to within fp tolerance.
    q_scaled = ((probe @ params["wq"].astype(jnp.float32)
                 + params["bq"].astype(jnp.float32)) * scale).astype(jnp.float32)   # (K, D)

    # Pre-split the fused kv projection so k / v come straight off the MXU with no lane slices.
    wkv, bkv = params["wkv"], params["bkv"]
    wk, wv = wkv[:, :D], wkv[:, D:]
    bk, bv = bkv[:, :D], bkv[:, D:]

    # Split SwishGLU's fused (4D -> 8D) projection into project / gate halves: halves the
    # single largest resident weight buffer (v7x only has 64 MiB VMEM) and removes the
    # lane-axis slice of h2 inside the kernel.
    w2, b2 = params["w2"], params["b2"]
    w2p, w2g = w2[:, :mlp_dim], w2[:, mlp_dim:]
    b2p, b2g = b2[:, :mlp_dim], b2[:, mlp_dim:]

    weights = [wk, bk, wv, bv,
               params["wp"], params["bp"], params["g"],
               params["w1"], params["b1"], w2p, b2p, w2g, b2g,
               params["w3"], params["b3"]]

    tb = batch_tile if batch_tile is not None else _pick_batch_tile(B, N, K, D)
    assert B % tb == 0, (B, tb)

    def _nbytes(a):
        return int(a.size) * jnp.dtype(a.dtype).itemsize

    resident_bytes = sum(_nbytes(w) for w in weights) + _nbytes(q_scaled)
    pipelined_bytes = 2 * 4 * (tb * N * D + tb * K * D)     # double-buffered x / out blocks (f32)
    vmem_limit = int(min(max(2 * (resident_bytes + pipelined_bytes) + (4 << 20), 32 << 20),
                         64 << 20))

    kernel = functools.partial(
        _map_block_kernel, n_heads=n_heads_eff, rms_eps=1e-8,
        tb=tb, n_latents=K)

    # Weights + precomputed q live in VMEM once for the whole call (no per-step DMA, no double
    # buffering); only the x / out blocks are pipelined over the batch grid.
    in_specs = ([pl.BlockSpec((tb, N, D), lambda b: (b, 0, 0))]
                + [pl.BlockSpec(memory_space=pltpu.MemorySpace.VMEM)
                   for _ in range(1 + len(weights))])

    out = pl.pallas_call(
        kernel,
        out_shape=jax.ShapeDtypeStruct((B, K, D), jnp.float32),
        grid=(B // tb,),
        in_specs=in_specs,
        out_specs=pl.BlockSpec((tb, K, D), lambda b: (b, 0, 0)),
        compiler_params=pltpu.CompilerParams(
            dimension_semantics=("parallel",),   # shards the batch grid across v7x's 2 TCs
            vmem_limit_bytes=vmem_limit),
    )(x.astype(jnp.float32), q_scaled, *weights)

    if K == 1:
        out = out.squeeze(1)
    return out


# ----------------------------------------------------------------------------- params
def init_params(key, n_latents, obs_dim, n_heads):
    """Deterministic synthetic parameters matching MAPBlock(n_latents, obs_dim, n_heads)."""
    D = obs_dim
    H = 2 * n_heads                     # MAPBlock internally doubles the head count
    assert D % H == 0, "obs_dim must be divisible by 2 * n_heads"
    mlp = int(4.0 * D)                  # mlp_ratio = 4.0
    ks = jax.random.split(key, 16)
    std = 0.02

    def w(k, shape):
        return jax.random.normal(k, shape, dtype=jnp.float32) * std

    params = dict(
        probe=w(ks[0], (n_latents, D)),                 # trunc-normal-ish probe
        wq=w(ks[1], (D, D)),        bq=w(ks[2], (1, D)),
        wkv=w(ks[3], (D, 2 * D)),   bkv=w(ks[4], (1, 2 * D)),
        wp=w(ks[5], (D, D)),        bp=w(ks[6], (1, D)),
        g=jnp.ones((1, D), jnp.float32),                # RMSNorm gain
        w1=w(ks[7], (D, mlp)),      b1=w(ks[8], (1, mlp)),
        w2=w(ks[9], (mlp, 2 * mlp)), b2=w(ks[10], (1, 2 * mlp)),
        w3=w(ks[11], (mlp, D)),     b3=w(ks[12], (1, D)),
    )
    return params, H


# ----------------------------------------------------------------------------- reference
def reference_forward(params, x, H, init_embed=None):
    B, N, D = x.shape
    K = params["probe"].shape[0]
    probe = jnp.broadcast_to(params["probe"][None], (B, K, D))
    if init_embed is not None:
        probe = probe + init_embed
    q = probe @ params["wq"] + params["bq"]
    kv = x @ params["wkv"] + params["bkv"]
    k, v = kv[..., :D], kv[..., D:]
    Dh = D // H
    scale = Dh ** -0.5
    qh = q.reshape(B, K, H, Dh).transpose(0, 2, 1, 3)
    kh = k.reshape(B, N, H, Dh).transpose(0, 2, 1, 3)
    vh = v.reshape(B, N, H, Dh).transpose(0, 2, 1, 3)
    scores = jnp.einsum("bhkd,bhnd->bhkn", qh, kh * scale)
    attn = jax.nn.softmax(scores, axis=-1)
    vals = jnp.einsum("bhkn,bhnd->bhkd", attn, vh).transpose(0, 2, 1, 3).reshape(B, K, D)
    latents = vals @ params["wp"] + params["bp"]
    norm = jnp.linalg.norm(latents, axis=-1, keepdims=True) * (D ** -0.5)
    normed = latents / jnp.maximum(norm, 1e-8) * params["g"]
    h1 = normed @ params["w1"] + params["b1"]
    h2 = h1 @ params["w2"] + params["b2"]
    half = h2.shape[-1] // 2
    sw = h2[..., :half] * jax.nn.silu(h2[..., half:])
    mlp_out = sw @ params["w3"] + params["b3"]
    out = mlp_out + latents
    return out.squeeze(1) if K == 1 else out


# ----------------------------------------------------------------------------- main
if __name__ == "__main__":
    # Small shapes: MAP_Adapter(n_latents=4, obs_dim=32, n_heads=2) on x of (B=2, N=8, D=32).
    n_latents, obs_dim, n_heads = 4, 32, 2
    B, N = 2, 8

    key = jax.random.PRNGKey(0)
    k_param, k_x = jax.random.split(key)
    params, H = init_params(k_param, n_latents, obs_dim, n_heads)
    x = jax.random.normal(k_x, (B, N, obs_dim), dtype=jnp.float32)

    out = jax.block_until_ready(map_adapter_forward(params, x, H))
    ref = jax.block_until_ready(reference_forward(params, x, H))

    assert out.shape == ref.shape, (out.shape, ref.shape)
    assert jnp.allclose(out, ref, rtol=2e-3, atol=2e-3), "Pallas output mismatch vs JAX reference"

    print("KERNEL_OK")
</pallas_src>

<mosaic_0001>
module attributes {stable_mosaic.version = 11 : i64} {
  func.func @_map_block_kernel(%arg0: i32, %arg1: memref<2x8x32xf32, #tpu.memory_space<vmem>>, %arg2: memref<4x32xf32, #tpu.memory_space<vmem>>, %arg3: memref<32x32xf32, #tpu.memory_space<vmem>>, %arg4: memref<1x32xf32, #tpu.memory_space<vmem>>, %arg5: memref<32x32xf32, #tpu.memory_space<vmem>>, %arg6: memref<1x32xf32, #tpu.memory_space<vmem>>, %arg7: memref<32x32xf32, #tpu.memory_space<vmem>>, %arg8: memref<1x32xf32, #tpu.memory_space<vmem>>, %arg9: memref<1x32xf32, #tpu.memory_space<vmem>>, %arg10: memref<32x128xf32, #tpu.memory_space<vmem>>, %arg11: memref<1x128xf32, #tpu.memory_space<vmem>>, %arg12: memref<128x128xf32, #tpu.memory_space<vmem>>, %arg13: memref<1x128xf32, #tpu.memory_space<vmem>>, %arg14: memref<128x128xf32, #tpu.memory_space<vmem>>, %arg15: memref<1x128xf32, #tpu.memory_space<vmem>>, %arg16: memref<128x32xf32, #tpu.memory_space<vmem>>, %arg17: memref<1x32xf32, #tpu.memory_space<vmem>>, %arg18: memref<2x4x32xf32, #tpu.memory_space<vmem>>) attributes {dimension_semantics = [#tpu.dimension_semantics<parallel>], iteration_bounds = array<i64: 1>, scalar_prefetch = 0 : i64, scratch_operands = 0 : i64, tpu.core_type = #tpu.core_type<tc>, window_params = [{transform_indices = @transform_0, window_bounds = array<i64: 2, 8, 32>}, {pipeline_mode = #tpu.pipeline_mode<synchronous>, transform_indices = @transform_1, window_bounds = array<i64: 4, 32>}, {pipeline_mode = #tpu.pipeline_mode<synchronous>, transform_indices = @transform_2, window_bounds = array<i64: 32, 32>}, {pipeline_mode = #tpu.pipeline_mode<synchronous>, transform_indices = @transform_3, window_bounds = array<i64: 1, 32>}, {pipeline_mode = #tpu.pipeline_mode<synchronous>, transform_indices = @transform_4, window_bounds = array<i64: 32, 32>}, {pipeline_mode = #tpu.pipeline_mode<synchronous>, transform_indices = @transform_5, window_bounds = array<i64: 1, 32>}, {pipeline_mode = #tpu.pipeline_mode<synchronous>, transform_indices = @transform_6, window_bounds = array<i64: 32, 32>}, {pipeline_mode = #tpu.pipeline_mode<synchronous>, transform_indices = @transform_7, window_bounds = array<i64: 1, 32>}, {pipeline_mode = #tpu.pipeline_mode<synchronous>, transform_indices = @transform_8, window_bounds = array<i64: 1, 32>}, {pipeline_mode = #tpu.pipeline_mode<synchronous>, transform_indices = @transform_9, window_bounds = array<i64: 32, 128>}, {pipeline_mode = #tpu.pipeline_mode<synchronous>, transform_indices = @transform_10, window_bounds = array<i64: 1, 128>}, {pipeline_mode = #tpu.pipeline_mode<synchronous>, transform_indices = @transform_11, window_bounds = array<i64: 128, 128>}, {pipeline_mode = #tpu.pipeline_mode<synchronous>, transform_indices = @transform_12, window_bounds = array<i64: 1, 128>}, {pipeline_mode = #tpu.pipeline_mode<synchronous>, transform_indices = @transform_13, window_bounds = array<i64: 128, 128>}, {pipeline_mode = #tpu.pipeline_mode<synchronous>, transform_indices = @transform_14, window_bounds = array<i64: 1, 128>}, {pipeline_mode = #tpu.pipeline_mode<synchronous>, transform_indices = @transform_15, window_bounds = array<i64: 128, 32>}, {pipeline_mode = #tpu.pipeline_mode<synchronous>, transform_indices = @transform_16, window_bounds = array<i64: 1, 32>}, {transform_indices = @transform_17, window_bounds = array<i64: 2, 4, 32>}]} {
    %c0 = arith.constant 0 : index
    %c0_0 = arith.constant 0 : index
    %c0_1 = arith.constant 0 : index
    %0 = vector.load %arg1[%c0, %c0_0, %c0_1] : memref<2x8x32xf32, #tpu.memory_space<vmem>>, vector<2x8x32xf32>
    %1 = vector.shape_cast %0 : vector<2x8x32xf32> to vector<16x32xf32>
    %c0_2 = arith.constant 0 : index
    %c0_3 = arith.constant 0 : index
    %2 = vector.load %arg2[%c0_2, %c0_3] : memref<4x32xf32, #tpu.memory_space<vmem>>, vector<4x32xf32>
    %c0_4 = arith.constant 0 : index
    %c0_5 = arith.constant 0 : index
    %3 = vector.load %arg3[%c0_4, %c0_5] : memref<32x32xf32, #tpu.memory_space<vmem>>, vector<32x32xf32>
    %cst = arith.constant dense<0.000000e+00> : vector<16x32xf32>
    %4 = tpu.matmul %1, %3, %cst {dimension_numbers = #tpu.dot_dimension_numbers<[1], [0], [0], [1], [0, 0, 1, 1], [], []>} : vector<16x32xf32>, vector<32x32xf32>, vector<16x32xf32> -> vector<16x32xf32>
    %c0_6 = arith.constant 0 : index
    %c0_7 = arith.constant 0 : index
    %5 = vector.load %arg4[%c0_6, %c0_7] : memref<1x32xf32, #tpu.memory_space<vmem>>, vector<1x32xf32>
    %6 = vector.broadcast %5 : vector<1x32xf32> to vector<16x32xf32>
    %7 = arith.addf %4, %6 : vector<16x32xf32>
    %8 = vector.shape_cast %7 : vector<16x32xf32> to vector<2x8x32xf32>
    %c0_8 = arith.constant 0 : index
    %c0_9 = arith.constant 0 : index
    %9 = vector.load %arg5[%c0_8, %c0_9] : memref<32x32xf32, #tpu.memory_space<vmem>>, vector<32x32xf32>
    %cst_10 = arith.constant dense<0.000000e+00> : vector<16x32xf32>
    %10 = tpu.matmul %1, %9, %cst_10 {dimension_numbers = #tpu.dot_dimension_numbers<[1], [0], [0], [1], [0, 0, 1, 1], [], []>} : vector<16x32xf32>, vector<32x32xf32>, vector<16x32xf32> -> vector<16x32xf32>
    %c0_11 = arith.constant 0 : index
    %c0_12 = arith.constant 0 : index
    %11 = vector.load %arg6[%c0_11, %c0_12] : memref<1x32xf32, #tpu.memory_space<vmem>>, vector<1x32xf32>
    %12 = vector.broadcast %11 : vector<1x32xf32> to vector<16x32xf32>
    %13 = arith.addf %10, %12 : vector<16x32xf32>
    %14 = vector.shape_cast %13 : vector<16x32xf32> to vector<2x8x32xf32>
    %15 = vector.extract_strided_slice %2 {offsets = [0, 0], sizes = [4, 8], strides = [1, 1]} : vector<4x32xf32> to vector<4x8xf32>
    %16 = vector.shape_cast %15 : vector<4x8xf32> to vector<1x4x8xf32>
    %17 = vector.shape_cast %16 : vector<1x4x8xf32> to vector<1x4x8xf32>
    %18 = vector.broadcast %17 : vector<1x4x8xf32> to vector<2x4x8xf32>
    %19 = vector.extract_strided_slice %8 {offsets = [0, 0, 0], sizes = [2, 8, 8], strides = [1, 1, 1]} : vector<2x8x32xf32> to vector<2x8x8xf32>
    %20 = vector.extract_strided_slice %14 {offsets = [0, 0, 0], sizes = [2, 8, 8], strides = [1, 1, 1]} : vector<2x8x32xf32> to vector<2x8x8xf32>
    "tpu.trace_start"() <{level = 10 : i32, message = "bkd,bnd->bkn"}> : () -> ()
    %cst_13 = arith.constant dense<0.000000e+00> : vector<2x4x8xf32>
    %21 = tpu.matmul %18, %19, %cst_13 {dimension_numbers = #tpu.dot_dimension_numbers<[2], [2], [1], [1], [0, 0, 0, 1, 1, 1], [0], [0]>} : vector<2x4x8xf32>, vector<2x8x8xf32>, vector<2x4x8xf32> -> vector<2x4x8xf32>
    "tpu.trace_stop"() : () -> ()
    %cst_14 = arith.constant dense<0xFF800000> : vector<2x4xf32>
    %22 = vector.multi_reduction <maximumf>, %21, %cst_14 [2] : vector<2x4x8xf32> to vector<2x4xf32>
    %23 = vector.shape_cast %22 : vector<2x4xf32> to vector<2x4x1xf32>
    %24 = vector.broadcast %23 : vector<2x4x1xf32> to vector<2x4x8xf32>
    %25 = arith.subf %21, %24 : vector<2x4x8xf32>
    %26 = math.exp %25 : vector<2x4x8xf32>
    %cst_15 = arith.constant dense<0.000000e+00> : vector<2x4xf32>
    %27 = vector.multi_reduction <add>, %26, %cst_15 [2] : vector<2x4x8xf32> to vector<2x4xf32>
    %28 = vector.shape_cast %27 : vector<2x4xf32> to vector<2x4x1xf32>
    %29 = tpu.reciprocal %28 {approx = true} : vector<2x4x1xf32> -> vector<2x4x1xf32>
    %30 = vector.broadcast %29 : vector<2x4x1xf32> to vector<2x4x8xf32>
    %31 = arith.mulf %26, %30 : vector<2x4x8xf32>
    "tpu.trace_start"() <{level = 10 : i32, message = "bkn,bnd->bkd"}> : () -> ()
    %cst_16 = arith.constant dense<0.000000e+00> : vector<2x4x8xf32>
    %32 = tpu.matmul %31, %20, %cst_16 {dimension_numbers = #tpu.dot_dimension_numbers<[2], [1], [1], [2], [0, 0, 0, 1, 1, 2], [0], [0]>} : vector<2x4x8xf32>, vector<2x8x8xf32>, vector<2x4x8xf32> -> vector<2x4x8xf32>
    "tpu.trace_stop"() : () -> ()
    %33 = vector.extract_strided_slice %2 {offsets = [0, 8], sizes = [4, 8], strides = [1, 1]} : vector<4x32xf32> to vector<4x8xf32>
    %34 = vector.shape_cast %33 : vector<4x8xf32> to vector<1x4x8xf32>
    %35 = vector.shape_cast %34 : vector<1x4x8xf32> to vector<1x4x8xf32>
    %36 = vector.broadcast %35 : vector<1x4x8xf32> to vector<2x4x8xf32>
    %37 = vector.extract_strided_slice %8 {offsets = [0, 0, 8], sizes = [2, 8, 8], strides = [1, 1, 1]} : vector<2x8x32xf32> to vector<2x8x8xf32>
    %38 = vector.extract_strided_slice %14 {offsets = [0, 0, 8], sizes = [2, 8, 8], strides = [1, 1, 1]} : vector<2x8x32xf32> to vector<2x8x8xf32>
    "tpu.trace_start"() <{level = 10 : i32, message = "bkd,bnd->bkn"}> : () -> ()
    %cst_17 = arith.constant dense<0.000000e+00> : vector<2x4x8xf32>
    %39 = tpu.matmul %36, %37, %cst_17 {dimension_numbers = #tpu.dot_dimension_numbers<[2], [2], [1], [1], [0, 0, 0, 1, 1, 1], [0], [0]>} : vector<2x4x8xf32>, vector<2x8x8xf32>, vector<2x4x8xf32> -> vector<2x4x8xf32>
    "tpu.trace_stop"() : () -> ()
    %cst_18 = arith.constant dense<0xFF800000> : vector<2x4xf32>
    %40 = vector.multi_reduction <maximumf>, %39, %cst_18 [2] : vector<2x4x8xf32> to vector<2x4xf32>
    %41 = vector.shape_cast %40 : vector<2x4xf32> to vector<2x4x1xf32>
    %42 = vector.broadcast %41 : vector<2x4x1xf32> to vector<2x4x8xf32>
    %43 = arith.subf %39, %42 : vector<2x4x8xf32>
    %44 = math.exp %43 : vector<2x4x8xf32>
    %cst_19 = arith.constant dense<0.000000e+00> : vector<2x4xf32>
    %45 = vector.multi_reduction <add>, %44, %cst_19 [2] : vector<2x4x8xf32> to vector<2x4xf32>
    %46 = vector.shape_cast %45 : vector<2x4xf32> to vector<2x4x1xf32>
    %47 = tpu.reciprocal %46 {approx = true} : vector<2x4x1xf32> -> vector<2x4x1xf32>
    %48 = vector.broadcast %47 : vector<2x4x1xf32> to vector<2x4x8xf32>
    %49 = arith.mulf %44, %48 : vector<2x4x8xf32>
    "tpu.trace_start"() <{level = 10 : i32, message = "bkn,bnd->bkd"}> : () -> ()
    %cst_20 = arith.constant dense<0.000000e+00> : vector<2x4x8xf32>
    %50 = tpu.matmul %49, %38, %cst_20 {dimension_numbers = #tpu.dot_dimension_numbers<[2], [1], [1], [2], [0, 0, 0, 1, 1, 2], [0], [0]>} : vector<2x4x8xf32>, vector<2x8x8xf32>, vector<2x4x8xf32> -> vector<2x4x8xf32>
    "tpu.trace_stop"() : () -> ()
    %51 = vector.extract_strided_slice %2 {offsets = [0, 16], sizes = [4, 8], strides = [1, 1]} : vector<4x32xf32> to vector<4x8xf32>
    %52 = vector.shape_cast %51 : vector<4x8xf32> to vector<1x4x8xf32>
    %53 = vector.shape_cast %52 : vector<1x4x8xf32> to vector<1x4x8xf32>
    %54 = vector.broadcast %53 : vector<1x4x8xf32> to vector<2x4x8xf32>
    %55 = vector.extract_strided_slice %8 {offsets = [0, 0, 16], sizes = [2, 8, 8], strides = [1, 1, 1]} : vector<2x8x32xf32> to vector<2x8x8xf32>
    %56 = vector.extract_strided_slice %14 {offsets = [0, 0, 16], sizes = [2, 8, 8], strides = [1, 1, 1]} : vector<2x8x32xf32> to vector<2x8x8xf32>
    "tpu.trace_start"() <{level = 10 : i32, message = "bkd,bnd->bkn"}> : () -> ()
    %cst_21 = arith.constant dense<0.000000e+00> : vector<2x4x8xf32>
    %57 = tpu.matmul %54, %55, %cst_21 {dimension_numbers = #tpu.dot_dimension_numbers<[2], [2], [1], [1], [0, 0, 0, 1, 1, 1], [0], [0]>} : vector<2x4x8xf32>, vector<2x8x8xf32>, vector<2x4x8xf32> -> vector<2x4x8xf32>
    "tpu.trace_stop"() : () -> ()
    %cst_22 = arith.constant dense<0xFF800000> : vector<2x4xf32>
    %58 = vector.multi_reduction <maximumf>, %57, %cst_22 [2] : vector<2x4x8xf32> to vector<2x4xf32>
    %59 = vector.shape_cast %58 : vector<2x4xf32> to vector<2x4x1xf32>
    %60 = vector.broadcast %59 : vector<2x4x1xf32> to vector<2x4x8xf32>
    %61 = arith.subf %57, %60 : vector<2x4x8xf32>
    %62 = math.exp %61 : vector<2x4x8xf32>
    %cst_23 = arith.constant dense<0.000000e+00> : vector<2x4xf32>
    %63 = vector.multi_reduction <add>, %62, %cst_23 [2] : vector<2x4x8xf32> to vector<2x4xf32>
    %64 = vector.shape_cast %63 : vector<2x4xf32> to vector<2x4x1xf32>
    %65 = tpu.reciprocal %64 {approx = true} : vector<2x4x1xf32> -> vector<2x4x1xf32>
    %66 = vector.broadcast %65 : vector<2x4x1xf32> to vector<2x4x8xf32>
    %67 = arith.mulf %62, %66 : vector<2x4x8xf32>
    "tpu.trace_start"() <{level = 10 : i32, message = "bkn,bnd->bkd"}> : () -> ()
    %cst_24 = arith.constant dense<0.000000e+00> : vector<2x4x8xf32>
    %68 = tpu.matmul %67, %56, %cst_24 {dimension_numbers = #tpu.dot_dimension_numbers<[2], [1], [1], [2], [0, 0, 0, 1, 1, 2], [0], [0]>} : vector<2x4x8xf32>, vector<2x8x8xf32>, vector<2x4x8xf32> -> vector<2x4x8xf32>
    "tpu.trace_stop"() : () -> ()
    %69 = vector.extract_strided_slice %2 {offsets = [0, 24], sizes = [4, 8], strides = [1, 1]} : vector<4x32xf32> to vector<4x8xf32>
    %70 = vector.shape_cast %69 : vector<4x8xf32> to vector<1x4x8xf32>
    %71 = vector.shape_cast %70 : vector<1x4x8xf32> to vector<1x4x8xf32>
    %72 = vector.broadcast %71 : vector<1x4x8xf32> to vector<2x4x8xf32>
    %73 = vector.extract_strided_slice %8 {offsets = [0, 0, 24], sizes = [2, 8, 8], strides = [1, 1, 1]} : vector<2x8x32xf32> to vector<2x8x8xf32>
    %74 = vector.extract_strided_slice %14 {offsets = [0, 0, 24], sizes = [2, 8, 8], strides = [1, 1, 1]} : vector<2x8x32xf32> to vector<2x8x8xf32>
    "tpu.trace_start"() <{level = 10 : i32, message = "bkd,bnd->bkn"}> : () -> ()
    %cst_25 = arith.constant dense<0.000000e+00> : vector<2x4x8xf32>
    %75 = tpu.matmul %72, %73, %cst_25 {dimension_numbers = #tpu.dot_dimension_numbers<[2], [2], [1], [1], [0, 0, 0, 1, 1, 1], [0], [0]>} : vector<2x4x8xf32>, vector<2x8x8xf32>, vector<2x4x8xf32> -> vector<2x4x8xf32>
    "tpu.trace_stop"() : () -> ()
    %cst_26 = arith.constant dense<0xFF800000> : vector<2x4xf32>
    %76 = vector.multi_reduction <maximumf>, %75, %cst_26 [2] : vector<2x4x8xf32> to vector<2x4xf32>
    %77 = vector.shape_cast %76 : vector<2x4xf32> to vector<2x4x1xf32>
    %78 = vector.broadcast %77 : vector<2x4x1xf32> to vector<2x4x8xf32>
    %79 = arith.subf %75, %78 : vector<2x4x8xf32>
    %80 = math.exp %79 : vector<2x4x8xf32>
    %cst_27 = arith.constant dense<0.000000e+00> : vector<2x4xf32>
    %81 = vector.multi_reduction <add>, %80, %cst_27 [2] : vector<2x4x8xf32> to vector<2x4xf32>
    %82 = vector.shape_cast %81 : vector<2x4xf32> to vector<2x4x1xf32>
    %83 = tpu.reciprocal %82 {approx = true} : vector<2x4x1xf32> -> vector<2x4x1xf32>
    %84 = vector.broadcast %83 : vector<2x4x1xf32> to vector<2x4x8xf32>
    %85 = arith.mulf %80, %84 : vector<2x4x8xf32>
    "tpu.trace_start"() <{level = 10 : i32, message = "bkn,bnd->bkd"}> : () -> ()
    %cst_28 = arith.constant dense<0.000000e+00> : vector<2x4x8xf32>
    %86 = tpu.matmul %85, %74, %cst_28 {dimension_numbers = #tpu.dot_dimension_numbers<[2], [1], [1], [2], [0, 0, 0, 1, 1, 2], [0], [0]>} : vector<2x4x8xf32>, vector<2x8x8xf32>, vector<2x4x8xf32> -> vector<2x4x8xf32>
    "tpu.trace_stop"() : () -> ()
    %87 = tpu.concatenate %32, %50, %68, %86 in 2 : vector<2x4x8xf32>, vector<2x4x8xf32>, vector<2x4x8xf32>, vector<2x4x8xf32> -> vector<2x4x32xf32>
    %88 = vector.shape_cast %87 : vector<2x4x32xf32> to vector<8x32xf32>
    %c0_29 = arith.constant 0 : index
    %c0_30 = arith.constant 0 : index
    %89 = vector.load %arg7[%c0_29, %c0_30] : memref<32x32xf32, #tpu.memory_space<vmem>>, vector<32x32xf32>
    %cst_31 = arith.constant dense<0.000000e+00> : vector<8x32xf32>
    %90 = tpu.matmul %88, %89, %cst_31 {dimension_numbers = #tpu.dot_dimension_numbers<[1], [0], [0], [1], [0, 0, 1, 1], [], []>} : vector<8x32xf32>, vector<32x32xf32>, vector<8x32xf32> -> vector<8x32xf32>
    %c0_32 = arith.constant 0 : index
    %c0_33 = arith.constant 0 : index
    %91 = vector.load %arg8[%c0_32, %c0_33] : memref<1x32xf32, #tpu.memory_space<vmem>>, vector<1x32xf32>
    %92 = vector.broadcast %91 : vector<1x32xf32> to vector<8x32xf32>
    %93 = arith.addf %90, %92 : vector<8x32xf32>
    %94 = arith.mulf %93, %93 : vector<8x32xf32>
    %cst_34 = arith.constant dense<0.000000e+00> : vector<8xf32>
    %95 = vector.multi_reduction <add>, %94, %cst_34 [1] : vector<8x32xf32> to vector<8xf32>
    %96 = vector.shape_cast %95 : vector<8xf32> to vector<8x1xf32>
    %97 = math.sqrt %96 : vector<8x1xf32>
    %cst_35 = arith.constant 0.176776692 : f32
    %98 = vector.broadcast %cst_35 : f32 to vector<8x1xf32>
    %99 = arith.mulf %97, %98 : vector<8x1xf32>
    %cst_36 = arith.constant 9.99999993E-9 : f32
    %100 = vector.broadcast %cst_36 : f32 to vector<8x1xf32>
    %101 = arith.maximumf %99, %100 : vector<8x1xf32>
    %102 = tpu.reciprocal %101 {approx = true} : vector<8x1xf32> -> vector<8x1xf32>
    %103 = vector.broadcast %102 : vector<8x1xf32> to vector<8x32xf32>
    %104 = arith.mulf %93, %103 : vector<8x32xf32>
    %c0_37 = arith.constant 0 : index
    %c0_38 = arith.constant 0 : index
    %105 = vector.load %arg9[%c0_37, %c0_38] : memref<1x32xf32, #tpu.memory_space<vmem>>, vector<1x32xf32>
    %106 = vector.broadcast %105 : vector<1x32xf32> to vector<8x32xf32>
    %107 = arith.mulf %104, %106 : vector<8x32xf32>
    %c0_39 = arith.constant 0 : index
    %c0_40 = arith.constant 0 : index
    %108 = vector.load %arg10[%c0_39, %c0_40] : memref<32x128xf32, #tpu.memory_space<vmem>>, vector<32x128xf32>
    %cst_41 = arith.constant dense<0.000000e+00> : vector<8x128xf32>
    %109 = tpu.matmul %107, %108, %cst_41 {dimension_numbers = #tpu.dot_dimension_numbers<[1], [0], [0], [1], [0, 0, 1, 1], [], []>} : vector<8x32xf32>, vector<32x128xf32>, vector<8x128xf32> -> vector<8x128xf32>
    %c0_42 = arith.constant 0 : index
    %c0_43 = arith.constant 0 : index
    %110 = vector.load %arg11[%c0_42, %c0_43] : memref<1x128xf32, #tpu.memory_space<vmem>>, vector<1x128xf32>
    %111 = vector.broadcast %110 : vector<1x128xf32> to vector<8x128xf32>
    %112 = arith.addf %109, %111 : vector<8x128xf32>
    %c0_44 = arith.constant 0 : index
    %c0_45 = arith.constant 0 : index
    %113 = vector.load %arg12[%c0_44, %c0_45] : memref<128x128xf32, #tpu.memory_space<vmem>>, vector<128x128xf32>
    %cst_46 = arith.constant dense<0.000000e+00> : vector<8x128xf32>
    %114 = tpu.matmul %112, %113, %cst_46 {dimension_numbers = #tpu.dot_dimension_numbers<[1], [0], [0], [1], [0, 0, 1, 1], [], []>} : vector<8x128xf32>, vector<128x128xf32>, vector<8x128xf32> -> vector<8x128xf32>
    %c0_47 = arith.constant 0 : index
    %c0_48 = arith.constant 0 : index
    %115 = vector.load %arg13[%c0_47, %c0_48] : memref<1x128xf32, #tpu.memory_space<vmem>>, vector<1x128xf32>
    %116 = vector.broadcast %115 : vector<1x128xf32> to vector<8x128xf32>
    %117 = arith.addf %114, %116 : vector<8x128xf32>
    %c0_49 = arith.constant 0 : index
    %c0_50 = arith.constant 0 : index
    %118 = vector.load %arg14[%c0_49, %c0_50] : memref<128x128xf32, #tpu.memory_space<vmem>>, vector<128x128xf32>
    %cst_51 = arith.constant dense<0.000000e+00> : vector<8x128xf32>
    %119 = tpu.matmul %112, %118, %cst_51 {dimension_numbers = #tpu.dot_dimension_numbers<[1], [0], [0], [1], [0, 0, 1, 1], [], []>} : vector<8x128xf32>, vector<128x128xf32>, vector<8x128xf32> -> vector<8x128xf32>
    %c0_52 = arith.constant 0 : index
    %c0_53 = arith.constant 0 : index
    %120 = vector.load %arg15[%c0_52, %c0_53] : memref<1x128xf32, #tpu.memory_space<vmem>>, vector<1x128xf32>
    %121 = vector.broadcast %120 : vector<1x128xf32> to vector<8x128xf32>
    %122 = arith.addf %119, %121 : vector<8x128xf32>
    %123 = arith.negf %122 : vector<8x128xf32>
    %124 = math.exp %123 : vector<8x128xf32>
    %cst_54 = arith.constant 1.000000e+00 : f32
    %125 = vector.broadcast %cst_54 : f32 to vector<8x128xf32>
    %126 = arith.addf %125, %124 : vector<8x128xf32>
    %127 = arith.divf %125, %126 : vector<8x128xf32>
    %128 = arith.mulf %122, %127 : vector<8x128xf32>
    %129 = arith.mulf %117, %128 : vector<8x128xf32>
    %c0_55 = arith.constant 0 : index
    %c0_56 = arith.constant 0 : index
    %130 = vector.load %arg16[%c0_55, %c0_56] : memref<128x32xf32, #tpu.memory_space<vmem>>, vector<128x32xf32>
    %cst_57 = arith.constant dense<0.000000e+00> : vector<8x32xf32>
    %131 = tpu.matmul %129, %130, %cst_57 {dimension_numbers = #tpu.dot_dimension_numbers<[1], [0], [0], [1], [0, 0, 1, 1], [], []>} : vector<8x128xf32>, vector<128x32xf32>, vector<8x32xf32> -> vector<8x32xf32>
    %c0_58 = arith.constant 0 : index
    %c0_59 = arith.constant 0 : index
    %132 = vector.load %arg17[%c0_58, %c0_59] : memref<1x32xf32, #tpu.memory_space<vmem>>, vector<1x32xf32>
    %133 = vector.broadcast %132 : vector<1x32xf32> to vector<8x32xf32>
    %134 = arith.addf %131, %133 : vector<8x32xf32>
    %135 = arith.addf %134, %93 : vector<8x32xf32>
    %136 = vector.shape_cast %135 : vector<8x32xf32> to vector<2x4x32xf32>
    %c0_60 = arith.constant 0 : index
    %c0_61 = arith.constant 0 : index
    %c0_62 = arith.constant 0 : index
    %137 = vector.load %arg18[%c0_60, %c0_61, %c0_62] : memref<2x4x32xf32, #tpu.memory_space<vmem>>, vector<2x4x32xf32>
    tpu.vector_store %arg18[%c0_60, %c0_61, %c0_62], %136 {strides = array<i32>} : memref<2x4x32xf32, #tpu.memory_space<vmem>>, vector<2x4x32xf32>,
    return
  }
  func.func @transform_0(%arg0: i32) -> (i32, i32, i32) {
    %c0_i32 = arith.constant 0 : i32
    %c0_i32_0 = arith.constant 0 : i32
    %c0_i32_1 = arith.constant 0 : i32
    return %arg0, %c0_i32, %c0_i32_0 : i32, i32, i32
  }
  func.func @transform_1(%arg0: i32) -> (i32, i32) {
    %c0_i32 = arith.constant 0 : i32
    %c0_i32_0 = arith.constant 0 : i32
    %c0_i32_1 = arith.constant 0 : i32
    return %c0_i32, %c0_i32_0 : i32, i32
  }
  func.func @transform_2(%arg0: i32) -> (i32, i32) {
    %c0_i32 = arith.constant 0 : i32
    %c0_i32_0 = arith.constant 0 : i32
    %c0_i32_1 = arith.constant 0 : i32
    return %c0_i32, %c0_i32_0 : i32, i32
  }
  func.func @transform_3(%arg0: i32) -> (i32, i32) {
    %c0_i32 = arith.constant 0 : i32
    %c0_i32_0 = arith.constant 0 : i32
    %c0_i32_1 = arith.constant 0 : i32
    return %c0_i32, %c0_i32_0 : i32, i32
  }
  func.func @transform_4(%arg0: i32) -> (i32, i32) {
    %c0_i32 = arith.constant 0 : i32
    %c0_i32_0 = arith.constant 0 : i32
    %c0_i32_1 = arith.constant 0 : i32
    return %c0_i32, %c0_i32_0 : i32, i32
  }
  func.func @transform_5(%arg0: i32) -> (i32, i32) {
    %c0_i32 = arith.constant 0 : i32
    %c0_i32_0 = arith.constant 0 : i32
    %c0_i32_1 = arith.constant 0 : i32
    return %c0_i32, %c0_i32_0 : i32, i32
  }
  func.func @transform_6(%arg0: i32) -> (i32, i32) {
    %c0_i32 = arith.constant 0 : i32
    %c0_i32_0 = arith.constant 0 : i32
    %c0_i32_1 = arith.constant 0 : i32
    return %c0_i32, %c0_i32_0 : i32, i32
  }
  func.func @transform_7(%arg0: i32) -> (i32, i32) {
    %c0_i32 = arith.constant 0 : i32
    %c0_i32_0 = arith.constant 0 : i32
    %c0_i32_1 = arith.constant 0 : i32
    return %c0_i32, %c0_i32_0 : i32, i32
  }
  func.func @transform_8(%arg0: i32) -> (i32, i32) {
    %c0_i32 = arith.constant 0 : i32
    %c0_i32_0 = arith.constant 0 : i32
    %c0_i32_1 = arith.constant 0 : i32
    return %c0_i32, %c0_i32_0 : i32, i32
  }
  func.func @transform_9(%arg0: i32) -> (i32, i32) {
    %c0_i32 = arith.constant 0 : i32
    %c0_i32_0 = arith.constant 0 : i32
    %c0_i32_1 = arith.constant 0 : i32
    return %c0_i32, %c0_i32_0 : i32, i32
  }
  func.func @transform_10(%arg0: i32) -> (i32, i32) {
    %c0_i32 = arith.constant 0 : i32
    %c0_i32_0 = arith.constant 0 : i32
    %c0_i32_1 = arith.constant 0 : i32
    return %c0_i32, %c0_i32_0 : i32, i32
  }
  func.func @transform_11(%arg0: i32) -> (i32, i32) {
    %c0_i32 = arith.constant 0 : i32
    %c0_i32_0 = arith.constant 0 : i32
    %c0_i32_1 = arith.constant 0 : i32
    return %c0_i32, %c0_i32_0 : i32, i32
  }
  func.func @transform_12(%arg0: i32) -> (i32, i32) {
    %c0_i32 = arith.constant 0 : i32
    %c0_i32_0 = arith.constant 0 : i32
    %c0_i32_1 = arith.constant 0 : i32
    return %c0_i32, %c0_i32_0 : i32, i32
  }
  func.func @transform_13(%arg0: i32) -> (i32, i32) {
    %c0_i32 = arith.constant 0 : i32
    %c0_i32_0 = arith.constant 0 : i32
    %c0_i32_1 = arith.constant 0 : i32
    return %c0_i32, %c0_i32_0 : i32, i32
  }
  func.func @transform_14(%arg0: i32) -> (i32, i32) {
    %c0_i32 = arith.constant 0 : i32
    %c0_i32_0 = arith.constant 0 : i32
    %c0_i32_1 = arith.constant 0 : i32
    return %c0_i32, %c0_i32_0 : i32, i32
  }
  func.func @transform_15(%arg0: i32) -> (i32, i32) {
    %c0_i32 = arith.constant 0 : i32
    %c0_i32_0 = arith.constant 0 : i32
    %c0_i32_1 = arith.constant 0 : i32
    return %c0_i32, %c0_i32_0 : i32, i32
  }
  func.func @transform_16(%arg0: i32) -> (i32, i32) {
    %c0_i32 = arith.constant 0 : i32
    %c0_i32_0 = arith.constant 0 : i32
    %c0_i32_1 = arith.constant 0 : i32
    return %c0_i32, %c0_i32_0 : i32, i32
  }
  func.func @transform_17(%arg0: i32) -> (i32, i32, i32) {
    %c0_i32 = arith.constant 0 : i32
    %c0_i32_0 = arith.constant 0 : i32
    %c0_i32_1 = arith.constant 0 : i32
    return %arg0, %c0_i32, %c0_i32_0 : i32, i32, i32
  }
}

</mosaic_0001>

<bundles_post_ra>
// kernel: tpu_custom_call.1
= control target key start
LH: loop header
LB: loop body
LE: loop exit
PB: predicated region body
PF: predicated region fallthrough
CT: control target
= control target key end

     0   :  { %s3344_s0 = inlined_call_operand.vmem [shape: f32[2,8,32], index: 0, kind: input, shape index: {}]   ;;  %s3345_s1 = inlined_call_operand.vmem [shape: f32[4,32], index: 1, kind: input, shape index: {}]   ;;  %s3346_s2 = inlined_call_operand.vmem [shape: f32[32,32], index: 2, kind: input, shape index: {}]   ;;  %s3347_s3 = inlined_call_operand.hbm [shape: f32[1,32], index: 3, kind: input, shape index: {}]   ;;  %s3348_s4 = inlined_call_operand.hbm [shape: f32[32,32], index: 4, kind: input, shape index: {}]   ;;  %s3349_s5 = inlined_call_operand.hbm [shape: f32[1,32], index: 5, kind: input, shape index: {}]   ;;  %s3350_s6 = inlined_call_operand.hbm [shape: f32[32,32], index: 6, kind: input, shape index: {}]   ;;  %s3351_s7 = inlined_call_operand.hbm [shape: f32[1,32], index: 7, kind: input, shape index: {}]   ;;  %s3352_s8 = inlined_call_operand.hbm [shape: f32[1,32], index: 8, kind: input, shape index: {}]   ;;  %s3353_s9 = inlined_call_operand.hbm [shape: f32[32,128], index: 9, kind: input, shape index: {}]   ;;  %s3354_s10 = inlined_call_operand.hbm [shape: f32[1,128], index: 10, kind: input, shape index: {}]   ;;  %s3355_s11 = inlined_call_operand.vmem [shape: f32[128,128], index: 11, kind: input, shape index: {}]   ;;  %s3356_s12 = inlined_call_operand.vmem [shape: f32[1,128], index: 12, kind: input, shape index: {}]   ;;  %s3357_s13 = inlined_call_operand.hbm [shape: f32[128,128], index: 13, kind: input, shape index: {}]   ;;  %s3358_s14 = inlined_call_operand.vmem [shape: f32[1,128], index: 14, kind: input, shape index: {}]   ;;  %s3359_s15 = inlined_call_operand.vmem [shape: f32[128,32], index: 15, kind: input, shape index: {}]   ;;  %s3360_s16 = inlined_call_operand.vmem [shape: f32[1,32], index: 16, kind: input, shape index: {}]   ;;  %s3361_s17 = inlined_call_operand.hbm [shape: f32[2,4,32], index: 17, kind: output, shape index: {}]  }
   0x1   :  { %3363 = sst [smem:[#allocation24_spill]] %s3344_s0 }
   0x2   :  { %3364 = sst [smem:[#allocation25_spill]] %s3345_s1 }
   0x3   :  { %22 = vsyncpa [#allocation3], 0 }
   0x4   :  { %23 = vsyncpa [#allocation6], 0 }
   0x5   :  { %24 = vsyncpa [#allocation9], 0 }
   0x6   :  { %25 = vsyncpa [#allocation12], 0 }
   0x7   :  { %26 = vsyncpa [#allocation15], 0 }
   0x8   :  { %27 = vsyncpa [#allocation4], 0  ;;  %s2836_s24 = smov [#allocation5]  }
   0x9   :  { %s49_s25 = sshll.u32 %s2836_s24, 4  ;;  %s50_s25 = int_to_ptr.vmem [resolvable:$true] %s49_s25 }
   0xa   :  { %s2632_s26 = scalar_lea.vmem %s50_s25, 512  ;;  %p2637_p1 = scmp.lt.s32.totalorder %s50_s25, %s50_s25 }
   0xb   :  { %p2633_p0 = scmp.ne.s32.totalorder %s50_s25, %s2632_s26  ;;  %p2638_p2 = scmp.lt.s32.totalorder %s2632_s26, %s2632_s26 }
   0xd   :  { %p2639_p3 = por %p2638_p2, %p2637_p1 }
   0xf   :  { %p2640_p4 = pnand %p2639_p3, %p2633_p0 }
  0x11   :  { %2643 = shalt.err (!%p2640_p4)
}
  0x12   :  { %s2837_s27 = smov 128   ;;  %s2838_s28 = smov 8  }
  0x13   :  { %55 = dma.hbm_to_vmem [thread:$0]  %s3348_s4, 512, %s50_s25, [#allocation6], %s2837_s27, %s2837_s27, %s2838_s28  }
  0x14   :  { %s2839_s30 = smov [#allocation8]   ;;  %s2840_s19 = smov [#allocation11]  }
  0x15   :  { %s71_s18 = sshll.u32 %s2839_s30, 4  ;;  %s94_s1 = sshll.u32 %s2840_s19, 4  ;;  %s72_s18 = int_to_ptr.vmem [resolvable:$true] %s71_s18  ;;  %s95_s1 = int_to_ptr.vmem [resolvable:$true] %s94_s1 }
  0x16   :  { %s2652_s20 = scalar_lea.vmem %s72_s18, 512  ;;  %p2657_p6 = scmp.lt.s32.totalorder %s72_s18, %s72_s18 }
  0x17   :  { %p2653_p5 = scmp.ne.s32.totalorder %s72_s18, %s2652_s20  ;;  %p2658_p7 = scmp.lt.s32.totalorder %s2652_s20, %s2652_s20 }
  0x19   :  { %p2659_p8 = por %p2658_p7, %p2657_p6 }
  0x1b   :  { %p2660_p9 = pnand %p2659_p8, %p2653_p5 }
  0x1d   :  { %2663 = shalt.err (!%p2660_p9)
}
  0x1e   :  { %77 = dma.hbm_to_vmem [thread:$0]  %s3350_s6, 512, %s72_s18, [#allocation9], %s2837_s27, %s2837_s27, %s2838_s28  }
  0x1f   :  { %s2672_s4 = scalar_lea.vmem %s95_s1, 16  ;;  %s2676_s23 = scalar_lea.vmem %s95_s1, 32 }
  0x20   :  { %p2673_p10 = scmp.ne.s32.totalorder %s95_s1, %s2672_s4  ;;  %p2677_p11 = scmp.lt.s32.totalorder %s95_s1, %s95_s1 }
  0x21   :  { %p2678_p12 = scmp.lt.s32.totalorder %s2676_s23, %s2672_s4 }
  0x23   :  { %p2679_p13 = por %p2678_p12, %p2677_p11 }
  0x25   :  { %p2680_p0 = pnand %p2679_p13, %p2673_p10 }
  0x27   :  { %2683 = shalt.err (!%p2680_p0)
}
  0x28   :  { %97 = dma.hbm_to_vmem [thread:$0]  %s3352_s8, 16, %s95_s1, [#allocation12]  }
  0x29   :  { %s2841_s26 = smov [#allocation14]   ;;  %s2842_s0 = smov [#allocation2]  }
  0x2a   :  { %s116_s29 = sshll.u32 %s2841_s26, 4  ;;  %s40_s30 = sshll.u32 %s2842_s0, 4  ;;  %s117_s29 = int_to_ptr.vmem [resolvable:$true] %s116_s29  ;;  %s41_s30 = int_to_ptr.vmem [resolvable:$true] %s40_s30 }
  0x2b   :  { %s2692_s19 = scalar_lea.vmem %s117_s29, 16  ;;  %s2696_s6 = scalar_lea.vmem %s117_s29, 32 }
  0x2c   :  { %p2693_p1 = scmp.ne.s32.totalorder %s117_s29, %s2692_s19  ;;  %p2697_p2 = scmp.lt.s32.totalorder %s117_s29, %s117_s29 }
  0x2d   :  { %p2698_p3 = scmp.lt.s32.totalorder %s2696_s6, %s2692_s19 }
  0x2f   :  { %p2699_p4 = por %p2698_p3, %p2697_p2 }
  0x31   :  { %p2700_p5 = pnand %p2699_p4, %p2693_p1 }
  0x33   :  { %2703 = shalt.err (!%p2700_p5)
}
  0x34   :  { %119 = dma.hbm_to_vmem [thread:$0]  %s3354_s10, 16, %s117_s29, [#allocation15]  }
  0x35   :  { %s2712_s21 = scalar_lea.vmem %s41_s30, 16  ;;  %s2716_s8 = scalar_lea.vmem %s41_s30, 32 }
  0x36   :  { %p2713_p6 = scmp.ne.s32.totalorder %s41_s30, %s2712_s21  ;;  %p2717_p7 = scmp.lt.s32.totalorder %s41_s30, %s41_s30 }
  0x37   :  { %p2718_p8 = scmp.lt.s32.totalorder %s2716_s8, %s2712_s21 }
  0x39   :  { %p2719_p9 = por %p2718_p8, %p2717_p7 }
  0x3b   :  { %p2720_p10 = pnand %p2719_p9, %p2713_p6 }
  0x3d   :  { %2723 = shalt.err (!%p2720_p10)
}
  0x3e   :  { %43 = dma.hbm_to_vmem [thread:$0]  %s3347_s3, 16, %s41_s30, [#allocation3]  }
  0x3f   :  { %s2843_s4 = smov [#allocation7]   ;;  %s2844_s24 = smov [#allocation10]  }
  0x40   :  { %s62_s23 = sshll.u32 %s2843_s4, 4  ;;  %s84_s25 = sshll.u32 %s2844_s24, 4  ;;  %s63_s23 = int_to_ptr.vmem [resolvable:$true] %s62_s23  ;;  %s85_s25 = int_to_ptr.vmem [resolvable:$true] %s84_s25 }
  0x41   :  { %s2732_s26 = scalar_lea.vmem %s63_s23, 16  ;;  %s2736_s10 = scalar_lea.vmem %s63_s23, 32 }
  0x42   :  { %p2733_p11 = scmp.ne.s32.totalorder %s63_s23, %s2732_s26  ;;  %p2737_p12 = scmp.lt.s32.totalorder %s63_s23, %s63_s23 }
  0x43   :  { %p2738_p13 = scmp.lt.s32.totalorder %s2736_s10, %s2732_s26 }
  0x45   :  { %p2739_p0 = por %p2738_p13, %p2737_p12 }
  0x47   :  { %p2740_p1 = pnand %p2739_p0, %p2733_p11 }
  0x49   :  { %2743 = shalt.err (!%p2740_p1)
}
  0x4a   :  { %65 = dma.hbm_to_vmem [thread:$0]  %s3349_s5, 16, %s63_s23, [#allocation6]  }
  0x4b   :  { %s2752_s19 = scalar_lea.vmem %s85_s25, 16  ;;  %s2756_s3 = scalar_lea.vmem %s85_s25, 32 }
  0x4c   :  { %p2753_p2 = scmp.ne.s32.totalorder %s85_s25, %s2752_s19  ;;  %p2757_p3 = scmp.lt.s32.totalorder %s85_s25, %s85_s25 }
  0x4d   :  { %p2758_p4 = scmp.lt.s32.totalorder %s2756_s3, %s2752_s19 }
  0x4f   :  { %p2759_p5 = por %p2758_p4, %p2757_p3 }
  0x51   :  { %p2760_p6 = pnand %p2759_p5, %p2753_p2 }
  0x53   :  { %2763 = shalt.err (!%p2760_p6)
}
  0x54   :  { %87 = dma.hbm_to_vmem [thread:$0]  %s3351_s7, 16, %s85_s25, [#allocation9]  }
  0x55   :  { %s2845_s18 = smov [#allocation13]   ;;  %s2846_s21 = smov [#allocation16]  }
  0x56   :  { %s103_s20 = sshll.u32 %s2845_s18, 4  ;;  %s129_s8 = sshll.u32 %s2846_s21, 4  ;;  %s104_s20 = int_to_ptr.vmem [resolvable:$true] %s103_s20  ;;  %s130_s8 = int_to_ptr.vmem [resolvable:$true] %s129_s8 }
  0x57   :  { %s2772_s1 = scalar_lea.vmem %s104_s20, 512  ;;  %p2777_p8 = scmp.lt.s32.totalorder %s104_s20, %s104_s20 }
  0x58   :  { %p2773_p7 = scmp.ne.s32.totalorder %s104_s20, %s2772_s1  ;;  %p2778_p9 = scmp.lt.s32.totalorder %s2772_s1, %s2772_s1 }
  0x5a   :  { %p2779_p10 = por %p2778_p9, %p2777_p8 }
  0x5c   :  { %p2780_p11 = pnand %p2779_p10, %p2773_p7 }
  0x5e   :  { %2783 = shalt.err (!%p2780_p11)
}
  0x5f   :  { %109 = dma.hbm_to_vmem [thread:$0]  %s3353_s9, 512, %s104_s20, [#allocation12], %s2837_s27, %s2837_s27, %s2838_s28  }
  0x60   :  { %s2792_s7 = scalar_lea.vmem %s130_s8, 2048  ;;  %p2797_p13 = scmp.lt.s32.totalorder %s130_s8, %s130_s8 }
  0x61   :  { %p2793_p12 = scmp.ne.s32.totalorder %s130_s8, %s2792_s7  ;;  %p2798_p0 = scmp.lt.s32.totalorder %s2792_s7, %s2792_s7 }
  0x63   :  { %p2799_p1 = por %p2798_p0, %p2797_p13 }
  0x65   :  { %p2800_p2 = pnand %p2799_p1, %p2793_p12 }
  0x67   :  { %2803 = shalt.err (!%p2800_p2)
}
  0x68   :  { %135 = dma.hbm_to_vmem [thread:$0]  %s3357_s13, 2048, %s130_s8, [#allocation15], %s2837_s27, %s2837_s27, %s2838_s28  }
  0x69   :  { %2824 = dma.done.wait [#allocation3], 16  }
  0x6a   :  { %2825 = vsyncadd [#allocation3], 4294967280 }
  0x6b   :  { %2826 = dma.done.wait [#allocation6], 528  }
  0x6c   :  { %2827 = vsyncadd [#allocation6], 4294966768 }
  0x6d   :  { %2828 = dma.done.wait [#allocation9], 528  }
  0x6e   :  { %2829 = vsyncadd [#allocation9], 4294966768 }
  0x6f   :  { %2830 = dma.done.wait [#allocation12], 528  }
  0x70   :  { %2831 = vsyncadd [#allocation12], 4294966768 }
  0x71   :  { %2832 = dma.done.wait [#allocation15], 2064  }
  0x72   :  { %2833 = vsyncadd [#allocation15], 4294965232  ;;  %vm183_vm0 = vcmask 261120   ;;  %v175_v0 = vld [vmem:[%s3346_s2 + $0x18] sm:$0xff]  ;;  %v174_v1 = vld [vmem:[%s3346_s2 + $0x10] sm:$0xff]  ;;  %s3365_s10 = sld [smem:[#allocation24_spill]] }
  0x73   :  { %2334 = vmatprep.subr.mxu1 %v175_v0  ;;  %v173_v3 = vld [vmem:[%s3346_s2 + $0x8] sm:$0xff]  ;;  %v172_v4 = vld [vmem:[%s3346_s2] sm:$0xff]  ;;  %v267_v7 = vld [vmem:[#allocation5 + $0x10] sm:$0xff]  ;;  %v2847_v10 = vmov 0.0   ;;  %vm2848_vm1 = vmmov 0   ;;  %vm351_vm2 = vcmask 64512  }
  0x74   :  { %2335 = vmatpush3.msra.mxu1 %v175_v0  ;;  %v268_v6 = vld [vmem:[#allocation5 + $0x18] sm:$0xff]  ;;  %v266_v8 = vld [vmem:[#allocation5 + $0x8] sm:$0xff]  ;;  %v265_v9 = vld [vmem:[#allocation5] sm:$0xff]  ;;  %2356 = vmatprep.subr.mxu0 %v2847_v10  ;;  %s2849_s2 = smov 120   ;;  %s3366_s21 = sld [smem:[#allocation25_spill]]  ;;  %vm501_vm3 = vcmask 60416  }
  0x75   :  { %2336 = vmatprep.subr.mxu1 %v174_v1  ;;  %2358 = vmatprep.mubr.msk.f32.mxu0 %vm2848_vm1, %v2847_v10  ;;  %v2190_v11 = vld [vmem:[#allocation2] ss:$0 sm:$0xff]  ;;  %v2193_v17 = vld [vmem:[#allocation7] ss:$0 sm:$0xff]  ;;  %s2850_s8 = smov 112   ;;  %s2851_s1 = smov 104  }
  0x76   :  { %2337 = vmatpush3.msra.mxu1 %v174_v1  ;;  %s2852_s5 = smov 16   ;;  %vm1676_vm4 = vcmask 130048   ;;  %vm1679_vm5 = vcmask 195584   ;;  %vm2166_vm8 = vcmask 257024   ;;  %s2854_s6 = smov [#allocation17]  }
  0x77   :  { %2338 = vmatprep.subr.mxu1 %v173_v3 }
  0x78   :  { %v169_v2 = vld [vmem:[%s3365_s10] sm:$0xff]  ;;  %2339 = vmatpush3.msra.mxu1 %v173_v3  ;;  %v170_v5 = vld [vmem:[%s3365_s10 + $0x8] sm:$0xff] }
  0x79   :  { %2342 = vmatprep.mubr.msk.f32.mxu1 %vm183_vm0, %v169_v2  ;;  %2340 = vmatprep.subr.mxu1 %v172_v4 }
  0x7a   :  { %2341 = vmatpush3.msra.mxu1 %v172_v4  ;;  %v3028_v16 = vld [vmem:[%s3366_s21] sm:$0xf] }
  0x7b   :  { %2343 = vmatmul.mubr.msk.f32.vlgmr.msra.gmra.mxu1 %vm183_vm0, %v170_v5  ;;  %2345 = vmatprep.subr.mxu1 %v268_v6 }
  0x7c   :  { %2346 = vmatpush3.msra.mxu1 %v268_v6  ;;  %2353 = vmatprep.mubr.msk.f32.mxu1 %vm183_vm0, %v169_v2 }
  0x7d   :  { %2347 = vmatprep.subr.mxu1 %v267_v7 }
  0x7e   :  { %2348 = vmatpush3.msra.mxu1 %v267_v7 }
  0x7f   :  { %2349 = vmatprep.subr.mxu1 %v266_v8 }
  0x80   :  { %2350 = vmatpush3.msra.mxu1 %v266_v8 }
  0x81   :  { %2351 = vmatprep.subr.mxu1 %v265_v9 }
  0x82   :  { %2352 = vmatpush3.msra.mxu1 %v265_v9 }
  0x83   :  { %2361 = vmatprep.subr.mxu1 %v2847_v10  ;;  %2354 = vmatmul.mubr.msk.f32.vlgmr.msra.gmra.mxu1 %vm183_vm0, %v170_v5 }
  0x84   :  { %2363 = vmatprep.mubr.msk.f32.mxu1 %vm2848_vm1, %v2847_v10 }
 0x13b   :  { %v2344_v12 = vpop.f32.mrf.mxu1 }
 0x13c   :  { %v3014_v13 = vadd.f32 %v2344_v12, %v2190_v11 }
 0x13d   :  { %v256_v14 = vpop.f32.mrf.mxu1 }
 0x13e   :  { %v3016_v15 = vadd.f32 %v2190_v11, %v256_v14  ;;  %748 = vrot.lane.b32.xlu1 %v3014_v13, %s2849_s2  ;;  %2362 = vmatpush3.xpose.msk.msra.mxu1 %vm351_vm2, %v3014_v13 }
 0x13f   :  { %2371 = vmatprep.subr.mxu1 %v2847_v10 }
 0x140   :  { %2357 = vmatpush3.xpose.msk.msra.mxu0 %vm351_vm2, %v3016_v15 }
 0x141   :  { %2364 = vmatmul.mubr.msk.f32.vlgmr.msra.gmra.mxu1 %vm351_vm2, %v3028_v16  ;;  %2366 = vmatprep.subr.mxu0 %v2847_v10 }
 0x142   :  { %2373 = vmatprep.mubr.msk.f32.mxu1 %vm2848_vm1, %v2847_v10 }
 0x143   :  { %2359 = vmatmul.mubr.msk.f32.vlgmr.msra.gmra.mxu0 %vm351_vm2, %v3028_v16  ;;  %v2355_v18 = vpop.f32.mrf.mxu1 }
 0x144   :  { %2368 = vmatprep.mubr.msk.f32.mxu0 %vm2848_vm1, %v2847_v10  ;;  %v3039_v19 = vadd.f32 %v2355_v18, %v2193_v17 }
 0x145   :  { %v342_v20 = vpop.f32.mrf.mxu1 }
 0x146   :  { %v3041_v21 = vadd.f32 %v2193_v17, %v342_v20  ;;  %2372 = vmatpush3.msra.mxu1 %v3039_v19 }
 0x147   :  { %2381 = vmatprep.subr.mxu1 %v2847_v10 }
 0x148   :  { %2367 = vmatpush3.msra.mxu0 %v3041_v21 }
 0x149   :  { %2376 = vmatprep.subr.mxu0 %v2847_v10 }
 0x1b0   :  { %v749_v38 = vpop.permute.xlu1 %748 }
 0x201   :  { %v497_v22 = vpop.f32.mrf.mxu1 }
 0x202   :  { %v505_v27 = vsel %vm501_vm3, %v497_v22, -inf }
 0x203   :  { %v424_v23 = vpop.f32.mrf.mxu0  ;;  %v2365_v24 = vpop.f32.mrf.mxu1 }
 0x204   :  { %v502_v25 = vsel %vm501_vm3, %v424_v23, -inf }
 0x205   :  { %503 = vmax.xlane.f32.xlu0 %v502_v25  ;;  %v2360_v26 = vpop.f32.mrf.mxu0 }
 0x209   :  { %506 = vmax.xlane.f32.xlu0 %v505_v27 }
 0x21f   :  { %672 = vrot.lane.b32.xlu0 %v3016_v15, %s2849_s2 }
 0x28e   :  { %v504_v28 = vpop.xlane.xlu0 %503 }
 0x28f   :  { %v508_v29 = vsub.f32 %v424_v23, %v504_v28 }
 0x291   :  { %v510_v32 = vmul.f32 1.442695, %v508_v29 }
 0x292   :  { %v507_v30 = vpop.xlane.xlu0 %506 }
 0x293   :  { %v509_v31 = vsub.f32 %v497_v22, %v507_v30 }
 0x295   :  { %v512_v33 = vmul.f32 1.442695, %v509_v31 }
 0x296   :  { %v673_v46 = vpop.permute.xlu0 %672 }
 0x297   :  { %2584 = vpow2.f32 %v512_v33 }
 0x298   :  { %2586 = vpow2.f32 %v510_v32 }
 0x2a4   :  { %v2585_v34 = vpop.eup %2584 }
 0x2a5   :  { %v517_v35 = vsel %vm501_vm3, %v2585_v34, 0.0  ;;  %v2587_v36 = vpop.eup %2586 }
 0x2a6   :  { %518 = vadd.xlane.f32.xlu1 %v517_v35  ;;  %v514_v37 = vsel %vm501_vm3, %v2587_v36, 0.0 }
 0x2aa   :  { %515 = vadd.xlane.f32.xlu1 %v514_v37 }
 0x2bb   :  { %670 = vrot.lane.b32.xlu1 %v3028_v16, %s2849_s2 }
 0x32f   :  { %v519_v39 = vpop.xlane.xlu1 %518 }
 0x330   :  { %2588 = vrcp.f32 %v519_v39 }
 0x333   :  { %v516_v40 = vpop.xlane.xlu1 %515 }
 0x334   :  { %2590 = vrcp.f32 %v516_v40 }
 0x337   :  { %v671_v44 = vpop.permute.xlu1 %670 }
 0x33d   :  { %v2589_v41 = vpop.eup %2588 }
 0x33e   :  { %v523_v42 = vmul.f32 %v2589_v41, %v2585_v34 }
 0x340   :  { %2374 = vmatmul.mubr.msk.f32.vlgmr.msra.gmra.mxu1 %vm351_vm2, %v523_v42 }
 0x341   :  { %v2591_v43 = vpop.eup %2590  ;;  %2382 = vmatpush3.xpose.msk.msra.mxu1 %vm351_vm2, %v749_v38  ;;  %2383 = vmatprep.mubr.msk.f32.mxu1 %vm2848_vm1, %v2847_v10 }
 0x342   :  { %v522_v45 = vmul.f32 %v2591_v43, %v2587_v36  ;;  %2391 = vmatprep.subr.mxu1 %v2847_v10 }
 0x344   :  { %2369 = vmatmul.mubr.msk.f32.vlgmr.msra.gmra.mxu0 %vm351_vm2, %v522_v45  ;;  %2384 = vmatmul.mubr.msk.f32.vlgmr.msra.gmra.mxu1 %vm351_vm2, %v671_v44 }
 0x345   :  { %2377 = vmatpush3.xpose.msk.msra.mxu0 %vm351_vm2, %v673_v46  ;;  %2378 = vmatprep.mubr.msk.f32.mxu0 %vm2848_vm1, %v2847_v10 }
 0x346   :  { %2386 = vmatprep.subr.mxu0 %v2847_v10  ;;  %2393 = vmatprep.mubr.msk.f32.mxu1 %vm2848_vm1, %v2847_v10 }
 0x348   :  { %2379 = vmatmul.mubr.msk.f32.vlgmr.msra.gmra.mxu0 %vm351_vm2, %v671_v44 }
 0x349   :  { %2388 = vmatprep.mubr.msk.f32.mxu0 %vm2848_vm1, %v2847_v10 }
 0x400   :  { %v3071_v47 = vpop.f32.mrf.mxu1 }
 0x402   :  { %v2375_v48 = vpop.f32.mrf.mxu1 }
 0x404   :  { %v3073_v49 = vpop.f32.mrf.mxu0  ;;  %v818_v50 = vpop.f32.mrf.mxu1 }
 0x405   :  { %v825_v51 = vsel %vm501_vm3, %v818_v50, -inf }
 0x406   :  { %826 = vmax.xlane.f32.xlu0 %v825_v51  ;;  %v2370_v52 = vpop.f32.mrf.mxu0  ;;  %v2385_v53 = vpop.f32.mrf.mxu1 }
 0x408   :  { %v744_v54 = vpop.f32.mrf.mxu0 }
 0x409   :  { %v822_v55 = vsel %vm501_vm3, %v744_v54, -inf }
 0x40a   :  { %823 = vmax.xlane.f32.xlu1 %v822_v55  ;;  %v2380_v56 = vpop.f32.mrf.mxu0 }
 0x41b   :  { %845 = vrot.lane.b32.xlu1 %v3041_v21, %s2849_s2 }
 0x41f   :  { %1000 = vrot.lane.b32.xlu1 %v3016_v15, %s2850_s8 }
 0x423   :  { %1076 = vrot.lane.b32.xlu1 %v3014_v13, %s2850_s8 }
 0x427   :  { %998 = vrot.lane.b32.xlu1 %v3028_v16, %s2850_s8 }
 0x48f   :  { %v827_v57 = vpop.xlane.xlu0 %826 }
 0x490   :  { %v829_v58 = vsub.f32 %v818_v50, %v827_v57 }
 0x492   :  { %v832_v59 = vmul.f32 1.442695, %v829_v58 }
 0x493   :  { %v824_v60 = vpop.xlane.xlu1 %823 }
 0x494   :  { %2592 = vpow2.f32 %v832_v59  ;;  %v828_v61 = vsub.f32 %v744_v54, %v824_v60 }
 0x496   :  { %v830_v62 = vmul.f32 1.442695, %v828_v61 }
 0x497   :  { %v846_v63 = vpop.permute.xlu1 %845 }
 0x498   :  { %2594 = vpow2.f32 %v830_v62  ;;  %2387 = vmatpush3.msra.mxu0 %v846_v63 }
 0x499   :  { %2396 = vmatprep.subr.mxu0 %v2847_v10 }
 0x49b   :  { %v1001_v6 = vpop.permute.xlu1 %1000 }
 0x49f   :  { %v1077_v9 = vpop.permute.xlu1 %1076 }
 0x4a1   :  { %v2593_v0 = vpop.eup %2592 }
 0x4a2   :  { %v837_v1 = vsel %vm501_vm3, %v2593_v0, 0.0 }
 0x4a3   :  { %838 = vadd.xlane.f32.xlu0 %v837_v1  ;;  %v999_v14 = vpop.permute.xlu1 %998 }
 0x4a5   :  { %v2595_v2 = vpop.eup %2594 }
 0x4a6   :  { %v834_v3 = vsel %vm501_vm3, %v2595_v2, 0.0 }
 0x4a7   :  { %835 = vadd.xlane.f32.xlu0 %v834_v3 }
 0x4bd   :  { %922 = vrot.lane.b32.xlu0 %v3039_v19, %s2849_s2  ;;  %s2174_s2 = sshll.u32 %s2854_s6, 4  ;;  %s2175_s2 = int_to_ptr.vmem [resolvable:$true] %s2174_s2 }
 0x4be   :  { %p2809_p4 = scmp.lt.s32.totalorder %s2175_s2, %s2175_s2 }
 0x52c   :  { %v839_v4 = vpop.xlane.xlu0 %838 }
 0x52d   :  { %2596 = vrcp.f32 %v839_v4 }
 0x530   :  { %v836_v5 = vpop.xlane.xlu0 %835 }
 0x531   :  { %2598 = vrcp.f32 %v836_v5 }
 0x534   :  { %v923_v7 = vpop.permute.xlu0 %922 }
 0x535   :  { %2392 = vmatpush3.msra.mxu1 %v923_v7 }
 0x536   :  { %2401 = vmatprep.subr.mxu1 %v2847_v10 }
 0x53a   :  { %v2597_v8 = vpop.eup %2596 }
 0x53b   :  { %v843_v11 = vmul.f32 %v2597_v8, %v2593_v0 }
 0x53d   :  { %2394 = vmatmul.mubr.msk.f32.vlgmr.msra.gmra.mxu1 %vm351_vm2, %v843_v11 }
 0x53e   :  { %v2599_v12 = vpop.eup %2598  ;;  %2402 = vmatpush3.xpose.msk.msra.mxu1 %vm351_vm2, %v1077_v9  ;;  %2403 = vmatprep.mubr.msk.f32.mxu1 %vm2848_vm1, %v2847_v10 }
 0x53f   :  { %v842_v17 = vmul.f32 %v2599_v12, %v2595_v2  ;;  %2411 = vmatprep.subr.mxu1 %v2847_v10 }
 0x541   :  { %2389 = vmatmul.mubr.msk.f32.vlgmr.msra.gmra.mxu0 %vm351_vm2, %v842_v17  ;;  %2404 = vmatmul.mubr.msk.f32.vlgmr.msra.gmra.mxu1 %vm351_vm2, %v999_v14  ;;  %v1684_v17 = vld [vmem:[#allocation8 + $0x10] sm:$0xff] }
 0x542   :  { %2397 = vmatpush3.xpose.msk.msra.mxu0 %vm351_vm2, %v1001_v6  ;;  %2398 = vmatprep.mubr.msk.f32.mxu0 %vm2848_vm1, %v2847_v10 }
 0x543   :  { %2406 = vmatprep.subr.mxu0 %v2847_v10  ;;  %2413 = vmatprep.mubr.msk.f32.mxu1 %vm2848_vm1, %v2847_v10 }
 0x545   :  { %2399 = vmatmul.mubr.msk.f32.vlgmr.msra.gmra.mxu0 %vm351_vm2, %v999_v14 }
 0x546   :  { %2408 = vmatprep.mubr.msk.f32.mxu0 %vm2848_vm1, %v2847_v10 }
 0x5fd   :  { %v3107_v18 = vpop.f32.mrf.mxu1 }
 0x5ff   :  { %v2395_v20 = vpop.f32.mrf.mxu1 }
 0x600   :  { %v1682_v20 = vld [vmem:[#allocation8] sm:$0xff] }
 0x601   :  { %v3109_v22 = vpop.f32.mrf.mxu0  ;;  %v1146_v23 = vpop.f32.mrf.mxu1 }
 0x602   :  { %v1153_v24 = vsel %vm501_vm3, %v1146_v23, -inf }
 0x603   :  { %1154 = vmax.xlane.f32.xlu1 %v1153_v24  ;;  %v2390_v25 = vpop.f32.mrf.mxu0  ;;  %v2405_v26 = vpop.f32.mrf.mxu1 }
 0x605   :  { %v1072_v27 = vpop.f32.mrf.mxu0 }
 0x606   :  { %v1150_v28 = vsel %vm501_vm3, %v1072_v27, -inf }
 0x607   :  { %1151 = vmax.xlane.f32.xlu0 %v1150_v28  ;;  %v2400_v29 = vpop.f32.mrf.mxu0 }
 0x614   :  { %1248 = vrot.lane.b32.xlu1 %v3039_v19, %s2850_s8 }
 0x618   :  { %1326 = vrot.lane.b32.xlu1 %v3016_v15, %s2851_s1 }
 0x61c   :  { %1402 = vrot.lane.b32.xlu1 %v3014_v13, %s2851_s1 }
 0x68c   :  { %v1155_v30 = vpop.xlane.xlu1 %1154 }
 0x68d   :  { %v1157_v31 = vsub.f32 %v1146_v23, %v1155_v30 }
 0x68f   :  { %v1160_v32 = vmul.f32 1.442695, %v1157_v31 }
 0x690   :  { %v1249_v33 = vpop.permute.xlu1 %1248  ;;  %v1152_v34 = vpop.xlane.xlu0 %1151 }
 0x691   :  { %2600 = vpow2.f32 %v1160_v32  ;;  %v1156_v35 = vsub.f32 %v1072_v27, %v1152_v34  ;;  %2412 = vmatpush3.msra.mxu1 %v1249_v33 }
 0x692   :  { %2421 = vmatprep.subr.mxu1 %v2847_v10 }
 0x693   :  { %v1158_v36 = vmul.f32 1.442695, %v1156_v35 }
 0x694   :  { %v1327_v42 = vpop.permute.xlu1 %1326 }
 0x695   :  { %2602 = vpow2.f32 %v1158_v36 }
 0x698   :  { %v1403_v45 = vpop.permute.xlu1 %1402 }
 0x69e   :  { %v2601_v37 = vpop.eup %2600 }
 0x69f   :  { %v1165_v38 = vsel %vm501_vm3, %v2601_v37, 0.0 }
 0x6a0   :  { %1166 = vadd.xlane.f32.xlu0 %v1165_v38 }
 0x6a2   :  { %v2603_v15 = vpop.eup %2602 }
 0x6a3   :  { %v1162_v39 = vsel %vm501_vm3, %v2603_v15, 0.0 }
 0x6a4   :  { %1163 = vadd.xlane.f32.xlu0 %v1162_v39 }
 0x6ba   :  { %1172 = vrot.lane.b32.xlu0 %v3041_v21, %s2850_s8 }
 0x6be   :  { %1324 = vrot.lane.b32.xlu0 %v3028_v16, %s2851_s1 }
 0x729   :  { %v1167_v13 = vpop.xlane.xlu0 %1166 }
 0x72a   :  { %2604 = vrcp.f32 %v1167_v13 }
 0x72d   :  { %v1164_v40 = vpop.xlane.xlu0 %1163 }
 0x72e   :  { %2606 = vrcp.f32 %v1164_v40 }
 0x731   :  { %v1173_v41 = vpop.permute.xlu0 %1172 }
 0x732   :  { %2407 = vmatpush3.msra.mxu0 %v1173_v41  ;;  %v1794_v41 = vld [vmem:[#allocation13 + $0x18] sm:$0xff] }
 0x733   :  { %2416 = vmatprep.subr.mxu0 %v2847_v10 }
 0x735   :  { %v1325_v16 = vpop.permute.xlu0 %1324 }
 0x737   :  { %v2605_v43 = vpop.eup %2604 }
 0x738   :  { %v1171_v44 = vmul.f32 %v2605_v43, %v2601_v37  ;;  %v1792_v43 = vld [vmem:[#allocation13 + $0x8] sm:$0xff] }
 0x73a   :  { %2414 = vmatmul.mubr.msk.f32.vlgmr.msra.gmra.mxu1 %vm351_vm2, %v1171_v44  ;;  %v1791_v44 = vld [vmem:[#allocation13] sm:$0xff] }
 0x73b   :  { %v2607_v46 = vpop.eup %2606  ;;  %2422 = vmatpush3.xpose.msk.msra.mxu1 %vm351_vm2, %v1403_v45  ;;  %2423 = vmatprep.mubr.msk.f32.mxu1 %vm2848_vm1, %v2847_v10  ;;  %v1890_v45 = vld [vmem:[%s3355_s11 + $0x78] sm:$0xff] }
 0x73c   :  { %v1170_v48 = vmul.f32 %v2607_v46, %v2603_v15  ;;  %2431 = vmatprep.subr.mxu1 %v2847_v10  ;;  %v2220_v15 = vld [vmem:[#allocation10] ss:$0 sm:$0xff]  ;;  %v1889_v46 = vld [vmem:[%s3355_s11 + $0x70] sm:$0xff] }
 0x73e   :  { %2409 = vmatmul.mubr.msk.f32.vlgmr.msra.gmra.mxu0 %vm351_vm2, %v1170_v48  ;;  %2424 = vmatmul.mubr.msk.f32.vlgmr.msra.gmra.mxu1 %vm351_vm2, %v1325_v16  ;;  %v1887_v48 = vld [vmem:[%s3355_s11 + $0x60] sm:$0xff] }
 0x73f   :  { %2417 = vmatpush3.xpose.msk.msra.mxu0 %vm351_vm2, %v1327_v42  ;;  %2418 = vmatprep.mubr.msk.f32.mxu0 %vm2848_vm1, %v2847_v10  ;;  %v1793_v42 = vld [vmem:[#allocation13 + $0x10] sm:$0xff] }
 0x740   :  { %2426 = vmatprep.subr.mxu0 %v2847_v10  ;;  %2433 = vmatprep.mubr.msk.f32.mxu1 %vm2848_vm1, %v2847_v10 }
 0x742   :  { %2419 = vmatmul.mubr.msk.f32.vlgmr.msra.gmra.mxu0 %vm351_vm2, %v1325_v16  ;;  %v1888_v16 = vld [vmem:[%s3355_s11 + $0x68] sm:$0xff] }
 0x743   :  { %2428 = vmatprep.mubr.msk.f32.mxu0 %vm2848_vm1, %v2847_v10 }
 0x7fa   :  { %v1320_v50 = vpop.f32.mrf.mxu1 }
 0x7fc   :  { %v2415_v51 = vpop.f32.mrf.mxu1 }
 0x7fd   :  { %v1885_v51 = vld [vmem:[%s3355_s11 + $0x50] sm:$0xff] }
 0x7fe   :  { %v1244_v52 = vpop.f32.mrf.mxu0  ;;  %v1472_v53 = vpop.f32.mrf.mxu1 }
 0x7ff   :  { %v1479_v54 = vsel %vm501_vm3, %v1472_v53, -inf }
 0x800   :  { %1480 = vmax.xlane.f32.xlu0 %v1479_v54  ;;  %v2410_v55 = vpop.f32.mrf.mxu0  ;;  %v2425_v56 = vpop.f32.mrf.mxu1  ;;  %v1882_v54 = vld [vmem:[%s3355_s11 + $0x38] sm:$0xff] }
 0x801   :  { %v1881_v55 = vld [vmem:[%s3355_s11 + $0x30] sm:$0xff]  ;;  %v1880_v56 = vld [vmem:[%s3355_s11 + $0x28] sm:$0xff] }
 0x802   :  { %v1398_v57 = vpop.f32.mrf.mxu0 }
 0x803   :  { %v1476_v58 = vsel %vm501_vm3, %v1398_v57, -inf }
 0x804   :  { %1477 = vmax.xlane.f32.xlu1 %v1476_v58  ;;  %v2420_v59 = vpop.f32.mrf.mxu0  ;;  %v1878_v58 = vld [vmem:[%s3355_s11 + $0x18] sm:$0xff] }
 0x805   :  { %v1877_v59 = vld [vmem:[%s3355_s11 + $0x10] sm:$0xff] }
 0x815   :  { %1498 = vrot.lane.b32.xlu1 %v3041_v21, %s2851_s1 }
 0x819   :  { %1652 = vrot.lane.b32.xlu1 %v3109_v22, %s2838_s28 }
 0x81d   :  { %1654 = vrot.lane.b32.xlu1 %v3107_v18, %s2838_s28  ;;  %v1683_v18 = vld [vmem:[#allocation8 + $0x8] sm:$0xff]  ;;  %s2853_s28 = smov 24  }
 0x821   :  { %1660 = vrot.lane.b32.xlu1 %v1244_v52, %s2852_s5  ;;  %v1884_v52 = vld [vmem:[%s3355_s11 + $0x48] sm:$0xff] }
 0x889   :  { %v1481_v60 = vpop.xlane.xlu0 %1480 }
 0x88a   :  { %v1483_v61 = vsub.f32 %v1472_v53, %v1481_v60  ;;  %v1883_v53 = vld [vmem:[%s3355_s11 + $0x40] sm:$0xff] }
 0x88c   :  { %v1486_v62 = vmul.f32 1.442695, %v1483_v61 }
 0x88d   :  { %v1478_v63 = vpop.xlane.xlu1 %1477 }
 0x88e   :  { %2608 = vpow2.f32 %v1486_v62  ;;  %v1482_v0 = vsub.f32 %v1398_v57, %v1478_v63  ;;  %v1879_v57 = vld [vmem:[%s3355_s11 + $0x20] sm:$0xff] }
 0x890   :  { %v1484_v1 = vmul.f32 1.442695, %v1482_v0 }
 0x891   :  { %v1499_v2 = vpop.permute.xlu1 %1498 }
 0x892   :  { %2610 = vpow2.f32 %v1484_v1  ;;  %2427 = vmatpush3.msra.mxu0 %v1499_v2 }
 0x893   :  { %2458 = vmatprep.subr.mxu0 %v2847_v10 }
 0x895   :  { %v1653_v26 = vpop.permute.xlu1 %1652 }
 0x896   :  { %v1674_v31 = vsel %vm351_vm2, %v3073_v49, %v1653_v26  ;;  %v1876_v26 = vld [vmem:[%s3355_s11 + $0x8] sm:$0xff] }
 0x899   :  { %v1655_v27 = vpop.permute.xlu1 %1654 }
 0x89a   :  { %v1675_v32 = vsel %vm351_vm2, %v3071_v47, %v1655_v27  ;;  %v1969_v27 = vld [vmem:[#allocation16 + $0x8] sm:$0xff] }
 0x89b   :  { %v2609_v21 = vpop.eup %2608 }
 0x89c   :  { %v1491_v3 = vsel %vm501_vm3, %v2609_v21, 0.0 }
 0x89d   :  { %1492 = vadd.xlane.f32.xlu0 %v1491_v3  ;;  %v1661_v29 = vpop.permute.xlu1 %1660 }
 0x89e   :  { %v1677_v33 = vsel %vm1676_vm4, %v1674_v31, %v1661_v29  ;;  %v1968_v29 = vld [vmem:[#allocation16] sm:$0xff] }
 0x89f   :  { %v2611_v4 = vpop.eup %2610 }
 0x8a0   :  { %v1488_v5 = vsel %vm501_vm3, %v2611_v4, 0.0 }
 0x8a1   :  { %1489 = vadd.xlane.f32.xlu0 %v1488_v5 }
 0x8b7   :  { %1574 = vrot.lane.b32.xlu0 %v3039_v19, %s2851_s1  ;;  %v1685_v19 = vld [vmem:[#allocation8 + $0x18] sm:$0xff] }
 0x8bb   :  { %1662 = vrot.lane.b32.xlu0 %v1320_v50, %s2852_s5  ;;  %v1886_v50 = vld [vmem:[%s3355_s11 + $0x58] sm:$0xff] }
 0x926   :  { %v1493_v6 = vpop.xlane.xlu0 %1492 }
 0x927   :  { %2612 = vrcp.f32 %v1493_v6 }
 0x92a   :  { %v1490_v7 = vpop.xlane.xlu0 %1489 }
 0x92b   :  { %2614 = vrcp.f32 %v1490_v7  ;;  %v1983_v7 = vld [vmem:[#allocation16 + $0x78] sm:$0xff] }
 0x92e   :  { %v1575_v8 = vpop.permute.xlu0 %1574 }
 0x92f   :  { %2432 = vmatpush3.msra.mxu1 %v1575_v8  ;;  %v1982_v8 = vld [vmem:[#allocation16 + $0x70] sm:$0xff] }
 0x930   :  { %2436 = vmatprep.subr.mxu1 %v2847_v10 }
 0x932   :  { %v1663_v28 = vpop.permute.xlu0 %1662 }
 0x933   :  { %v1678_v34 = vsel %vm1676_vm4, %v1675_v32, %v1663_v28  ;;  %v1875_v28 = vld [vmem:[%s3355_s11] sm:$0xff] }
 0x934   :  { %v2613_v9 = vpop.eup %2612 }
 0x935   :  { %v1497_v11 = vmul.f32 %v2613_v9, %v2609_v21  ;;  %v1981_v9 = vld [vmem:[#allocation16 + $0x68] sm:$0xff] }
 0x937   :  { %2434 = vmatmul.mubr.msk.f32.vlgmr.msra.gmra.mxu1 %vm351_vm2, %v1497_v11  ;;  %v1980_v11 = vld [vmem:[#allocation16 + $0x60] sm:$0xff] }
 0x938   :  { %v2615_v12 = vpop.eup %2614  ;;  %2444 = vmatprep.mubr.msk.f32.mxu1 %vm2848_vm1, %v2847_v10  ;;  %2437 = vmatpush3.msra.mxu1 %v1685_v19  ;;  %v1977_v19 = vld [vmem:[#allocation16 + $0x48] sm:$0xff] }
 0x939   :  { %v1496_v14 = vmul.f32 %v2615_v12, %v2611_v4  ;;  %2438 = vmatprep.subr.mxu1 %v2847_v10  ;;  %v2222_v4 = vld [vmem:[#allocation11] ss:$0 sm:$0xff] }
 0x93a   :  { %2439 = vmatpush3.msra.mxu1 %v1684_v17  ;;  %v1979_v12 = vld [vmem:[#allocation16 + $0x58] sm:$0xff]  ;;  %v1976_v17 = vld [vmem:[#allocation16 + $0x40] sm:$0xff] }
 0x93b   :  { %2429 = vmatmul.mubr.msk.f32.vlgmr.msra.gmra.mxu0 %vm351_vm2, %v1496_v14  ;;  %2440 = vmatprep.subr.mxu1 %v2847_v10  ;;  %v1978_v14 = vld [vmem:[#allocation16 + $0x50] sm:$0xff] }
 0x93c   :  { %2490 = vmatprep.mubr.msk.f32.mxu0 %vm2848_vm1, %v2847_v10  ;;  %2441 = vmatpush3.msra.mxu1 %v1683_v18  ;;  %v1975_v18 = vld [vmem:[#allocation16 + $0x38] sm:$0xff] }
 0x93d   :  { %2442 = vmatprep.subr.mxu1 %v2847_v10  ;;  %2459 = vmatpush3.msra.mxu0 %v1890_v45  ;;  %v2070_v45 = vld [vmem:[%s3359_s15 + $0x8] sm:$0xff] }
 0x93e   :  { %2443 = vmatpush3.msra.mxu1 %v1682_v20  ;;  %2460 = vmatprep.subr.mxu0 %v2847_v10  ;;  %v1974_v20 = vld [vmem:[#allocation16 + $0x30] sm:$0xff] }
 0x93f   :  { %2447 = vmatprep.subr.mxu1 %v2847_v10  ;;  %2461 = vmatpush3.msra.mxu0 %v1889_v46  ;;  %v2069_v46 = vld [vmem:[%s3359_s15] sm:$0xff] }
 0x940   :  { %2462 = vmatprep.subr.mxu0 %v2847_v10 }
 0x941   :  { %2463 = vmatpush3.msra.mxu0 %v1888_v16  ;;  %v2226_v16 = vld [vmem:[%s3358_s14] ss:$0 sm:$0xff] }
 0x942   :  { %2464 = vmatprep.subr.mxu0 %v2847_v10 }
 0x943   :  { %2465 = vmatpush3.msra.mxu0 %v1887_v48 }
 0x944   :  { %2466 = vmatprep.subr.mxu0 %v2847_v10 }
 0x945   :  { %2467 = vmatpush3.msra.mxu0 %v1886_v50 }
 0x946   :  { %2468 = vmatprep.subr.mxu0 %v2847_v10 }
 0x947   :  { %2469 = vmatpush3.msra.mxu0 %v1885_v51 }
 0x948   :  { %2470 = vmatprep.subr.mxu0 %v2847_v10 }
 0x949   :  { %2471 = vmatpush3.msra.mxu0 %v1884_v52 }
 0x94a   :  { %2472 = vmatprep.subr.mxu0 %v2847_v10 }
 0x94b   :  { %2473 = vmatpush3.msra.mxu0 %v1883_v53 }
 0x94c   :  { %2474 = vmatprep.subr.mxu0 %v2847_v10 }
 0x94d   :  { %2475 = vmatpush3.msra.mxu0 %v1882_v54 }
 0x94e   :  { %2476 = vmatprep.subr.mxu0 %v2847_v10 }
 0x94f   :  { %2477 = vmatpush3.msra.mxu0 %v1881_v55 }
 0x950   :  { %2478 = vmatprep.subr.mxu0 %v2847_v10 }
 0x951   :  { %2479 = vmatpush3.msra.mxu0 %v1880_v56 }
 0x952   :  { %2480 = vmatprep.subr.mxu0 %v2847_v10 }
 0x953   :  { %2481 = vmatpush3.msra.mxu0 %v1879_v57  ;;  %v2225_v57 = vld [vmem:[%s3356_s12] ss:$0 sm:$0xff]  ;;  %s2804_s12 = scalar_lea.vmem %s2175_s2, 128 }
 0x954   :  { %2482 = vmatprep.subr.mxu0 %v2847_v10  ;;  %p2805_p3 = scmp.ne.s32.totalorder %s2175_s2, %s2804_s12  ;;  %p2810_p5 = scmp.lt.s32.totalorder %s2804_s12, %s2804_s12 }
 0x955   :  { %2483 = vmatpush3.msra.mxu0 %v1878_v58 }
 0x956   :  { %2484 = vmatprep.subr.mxu0 %v2847_v10  ;;  %p2811_p6 = por %p2810_p5, %p2809_p4 }
 0x957   :  { %2485 = vmatpush3.msra.mxu0 %v1877_v59 }
 0x958   :  { %2486 = vmatprep.subr.mxu0 %v2847_v10  ;;  %p2812_p7 = pnand %p2811_p6, %p2805_p3 }
 0x959   :  { %2487 = vmatpush3.msra.mxu0 %v1876_v26 }
 0x95a   :  { %2488 = vmatprep.subr.mxu0 %v2847_v10 }
 0x95b   :  { %2489 = vmatpush3.msra.mxu0 %v1875_v28 }
 0x95c   :  { %2528 = vmatprep.subr.mxu0 %v2847_v10 }
 0x9f7   :  { %v1646_v22 = vpop.f32.mrf.mxu1 }
 0x9f8   :  { %1670 = vrot.lane.b32.xlu0 %v1646_v22, %s2853_s28  ;;  %v1973_v22 = vld [vmem:[#allocation16 + $0x28] sm:$0xff] }
 0x9f9   :  { %v2435_v23 = vpop.f32.mrf.mxu1 }
 0x9fa   :  { %v1972_v23 = vld [vmem:[#allocation16 + $0x20] sm:$0xff] }
 0x9fb   :  { %v1570_v24 = vpop.f32.mrf.mxu0 }
 0x9fc   :  { %1668 = vrot.lane.b32.xlu1 %v1570_v24, %s2853_s28  ;;  %v1971_v24 = vld [vmem:[#allocation16 + $0x18] sm:$0xff] }
 0x9fd   :  { %v2430_v25 = vpop.f32.mrf.mxu0 }
 0x9fe   :  { %v1970_v25 = vld [vmem:[#allocation16 + $0x10] sm:$0xff] }
 0xa6a   :  { %v1671_v30 = vpop.permute.xlu0 %1670 }
 0xa6b   :  { %v1681_v36 = vsel %vm1679_vm5, %v1678_v34, %v1671_v30  ;;  %v2223_v30 = vld [vmem:[#allocation14] ss:$0 sm:$0xff]  ;;  %v2084_v34 = vld [vmem:[%s3359_s15 + $0x78] sm:$0xff] }
 0xa6e   :  { %v1669_v35 = vpop.permute.xlu1 %1668 }
 0xa6f   :  { %v1680_v37 = vsel %vm1679_vm5, %v1677_v33, %v1669_v35  ;;  %v2083_v35 = vld [vmem:[%s3359_s15 + $0x70] sm:$0xff] }
 0xa70   :  { %v1695_v38 = vcombine.low %v1680_v37, %v1681_v36  ;;  %v2082_v36 = vld [vmem:[%s3359_s15 + $0x68] sm:$0xff]  ;;  %v2081_v37 = vld [vmem:[%s3359_s15 + $0x60] sm:$0xff] }
 0xa72   :  { %2445 = vmatmul.mubr.msk.f32.vlgmr.msra.gmra.mxu1 %vm183_vm0, %v1695_v38  ;;  %v2080_v38 = vld [vmem:[%s3359_s15 + $0x58] sm:$0xff] }
 0xa73   :  { %2455 = vmatprep.mubr.msk.f32.mxu1 %vm2848_vm1, %v2847_v10  ;;  %2448 = vmatpush3.msra.mxu1 %v1794_v41  ;;  %v2074_v41 = vld [vmem:[%s3359_s15 + $0x28] sm:$0xff] }
 0xa74   :  { %2449 = vmatprep.subr.mxu1 %v2847_v10 }
 0xa75   :  { %2450 = vmatpush3.msra.mxu1 %v1793_v42  ;;  %v2073_v42 = vld [vmem:[%s3359_s15 + $0x20] sm:$0xff] }
 0xa76   :  { %2451 = vmatprep.subr.mxu1 %v2847_v10 }
 0xa77   :  { %2452 = vmatpush3.msra.mxu1 %v1792_v43  ;;  %v2072_v43 = vld [vmem:[%s3359_s15 + $0x18] sm:$0xff] }
 0xa78   :  { %2453 = vmatprep.subr.mxu1 %v2847_v10 }
 0xa79   :  { %2454 = vmatpush3.msra.mxu1 %v1791_v44  ;;  %v2071_v44 = vld [vmem:[%s3359_s15 + $0x10] sm:$0xff] }
 0xa7a   :  { %2493 = vmatprep.subr.mxu1 %v2847_v10 }
 0xb32   :  { %v1764_v39 = vpop.f32.mrf.mxu1 }
 0xb33   :  { %v3174_v13 = vadd.f32 %v2220_v15, %v1764_v39  ;;  %v2079_v15 = vld [vmem:[%s3359_s15 + $0x50] sm:$0xff]  ;;  %v2078_v39 = vld [vmem:[%s3359_s15 + $0x48] sm:$0xff] }
 0xb34   :  { %v2446_v40 = vpop.f32.mrf.mxu1 }
 0xb35   :  { %v1768_v49 = vmul.f32 %v3174_v13, %v3174_v13  ;;  %v2077_v40 = vld [vmem:[%s3359_s15 + $0x40] sm:$0xff] }
 0xb37   :  { %v1769_v47 = vsel %vm183_vm0, %v1768_v49, 0.0  ;;  %v2076_v49 = vld [vmem:[%s3359_s15 + $0x38] sm:$0xff] }
 0xb38   :  { %1770 = vadd.xlane.f32.xlu1 %v1769_v47  ;;  %v2075_v47 = vld [vmem:[%s3359_s15 + $0x30] sm:$0xff] }
 0xbc1   :  { %v1771_v60 = vpop.xlane.xlu1 %1770 }
 0xbc2   :  { %2616 = vrsqrt.f32 %v1771_v60  ;;  %vm1774_vm6 = vcmp.eq.f32.partialorder %v1771_v60, inf  ;;  %v1777_v63 = vand.u32 2147483648, %v1771_v60  ;;  %vm1776_vm7 = vcmp.eq.f32.partialorder %v1771_v60, 0.0 }
 0xbcf   :  { %v2617_v61 = vpop.eup %2616 }
 0xbd0   :  { %v1773_v62 = vmul.f32 %v2617_v61, %v1771_v60  ;;  %v2228_v61 = vld [vmem:[%s3360_s16] ss:$0 sm:$0xff] }
 0xbd2   :  { %v1775_v0 = vsel %vm1774_vm6, %v1771_v60, %v1773_v62 }
 0xbd3   :  { %v1778_v1 = vsel %vm1776_vm7, %v1777_v63, %v1775_v0 }
 0xbd4   :  { %v1779_v2 = vmul.f32 0.17677669, %v1778_v1 }
 0xbd6   :  { %v1780_v21 = vmax.f32 %v1779_v2, 1e-08 }
 0xbd8   :  { %2618 = vrcp.f32 %v1780_v21 }
 0xbe5   :  { %v2619_v3 = vpop.eup %2618 }
 0xbe6   :  { %v1782_v5 = vmul.f32 %v2619_v3, %v3174_v13 }
 0xbe8   :  { %v1790_v6 = vmul.f32 %v2222_v4, %v1782_v5 }
 0xbea   :  { %2456 = vmatmul.mubr.msk.f32.vlgmr.msra.gmra.mxu1 %vm183_vm0, %v1790_v6 }
 0xbeb   :  { %2494 = vmatpush3.msra.mxu1 %v1983_v7  ;;  %2525 = vmatprep.mubr.msk.f32.mxu1 %vm2848_vm1, %v2847_v10 }
 0xbec   :  { %2495 = vmatprep.subr.mxu1 %v2847_v10 }
 0xbed   :  { %2496 = vmatpush3.msra.mxu1 %v1982_v8 }
 0xbee   :  { %2497 = vmatprep.subr.mxu1 %v2847_v10 }
 0xbef   :  { %2498 = vmatpush3.msra.mxu1 %v1981_v9 }
 0xbf0   :  { %2499 = vmatprep.subr.mxu1 %v2847_v10 }
 0xbf1   :  { %2500 = vmatpush3.msra.mxu1 %v1980_v11 }
 0xbf2   :  { %2501 = vmatprep.subr.mxu1 %v2847_v10 }
 0xbf3   :  { %2502 = vmatpush3.msra.mxu1 %v1979_v12 }
 0xbf4   :  { %2503 = vmatprep.subr.mxu1 %v2847_v10 }
 0xbf5   :  { %2504 = vmatpush3.msra.mxu1 %v1978_v14 }
 0xbf6   :  { %2505 = vmatprep.subr.mxu1 %v2847_v10 }
 0xbf7   :  { %2506 = vmatpush3.msra.mxu1 %v1977_v19 }
 0xbf8   :  { %2507 = vmatprep.subr.mxu1 %v2847_v10 }
 0xbf9   :  { %2508 = vmatpush3.msra.mxu1 %v1976_v17 }
 0xbfa   :  { %2509 = vmatprep.subr.mxu1 %v2847_v10 }
 0xbfb   :  { %2510 = vmatpush3.msra.mxu1 %v1975_v18 }
 0xbfc   :  { %2511 = vmatprep.subr.mxu1 %v2847_v10 }
 0xbfd   :  { %2512 = vmatpush3.msra.mxu1 %v1974_v20 }
 0xbfe   :  { %2513 = vmatprep.subr.mxu1 %v2847_v10 }
 0xbff   :  { %2514 = vmatpush3.msra.mxu1 %v1973_v22 }
 0xc00   :  { %2515 = vmatprep.subr.mxu1 %v2847_v10 }
 0xc01   :  { %2516 = vmatpush3.msra.mxu1 %v1972_v23 }
 0xc02   :  { %2517 = vmatprep.subr.mxu1 %v2847_v10 }
 0xc03   :  { %2518 = vmatpush3.msra.mxu1 %v1971_v24 }
 0xc04   :  { %2519 = vmatprep.subr.mxu1 %v2847_v10 }
 0xc05   :  { %2520 = vmatpush3.msra.mxu1 %v1970_v25 }
 0xc06   :  { %2521 = vmatprep.subr.mxu1 %v2847_v10 }
 0xc07   :  { %2522 = vmatpush3.msra.mxu1 %v1969_v27 }
 0xc08   :  { %2523 = vmatprep.subr.mxu1 %v2847_v10 }
 0xc09   :  { %2524 = vmatpush3.msra.mxu1 %v1968_v29 }
 0xcaa   :  { %v1871_v31 = vpop.f32.mrf.mxu1 }
 0xcab   :  { %v1872_v32 = vadd.f32 %v2223_v30, %v1871_v31 }
 0xcac   :  { %v2457_v33 = vpop.f32.mrf.mxu1 }
 0xcad   :  { %2491 = vmatmul.mubr.f32.vlgmr.msra.gmra.mxu0 %v1872_v32  ;;  %2526 = vmatmul.mubr.f32.vlgmr.msra.gmra.mxu1 %v1872_v32 }
 0xcae   :  { %2560 = vmatprep.mubr.msk.f32.mxu0 %vm2848_vm1, %v2847_v10  ;;  %2529 = vmatpush3.msra.mxu0 %v2084_v34 }
 0xcaf   :  { %2530 = vmatprep.subr.mxu0 %v2847_v10 }
 0xcb0   :  { %2531 = vmatpush3.msra.mxu0 %v2083_v35 }
 0xcb1   :  { %2532 = vmatprep.subr.mxu0 %v2847_v10 }
 0xcb2   :  { %2533 = vmatpush3.msra.mxu0 %v2082_v36 }
 0xcb3   :  { %2534 = vmatprep.subr.mxu0 %v2847_v10 }
 0xcb4   :  { %2535 = vmatpush3.msra.mxu0 %v2081_v37 }
 0xcb5   :  { %2536 = vmatprep.subr.mxu0 %v2847_v10 }
 0xcb6   :  { %2537 = vmatpush3.msra.mxu0 %v2080_v38 }
 0xcb7   :  { %2538 = vmatprep.subr.mxu0 %v2847_v10 }
 0xcb8   :  { %2539 = vmatpush3.msra.mxu0 %v2079_v15 }
 0xcb9   :  { %2540 = vmatprep.subr.mxu0 %v2847_v10 }
 0xcba   :  { %2541 = vmatpush3.msra.mxu0 %v2078_v39 }
 0xcbb   :  { %2542 = vmatprep.subr.mxu0 %v2847_v10 }
 0xcbc   :  { %2543 = vmatpush3.msra.mxu0 %v2077_v40 }
 0xcbd   :  { %2544 = vmatprep.subr.mxu0 %v2847_v10 }
 0xcbe   :  { %2545 = vmatpush3.msra.mxu0 %v2076_v49 }
 0xcbf   :  { %2546 = vmatprep.subr.mxu0 %v2847_v10 }
 0xcc0   :  { %2547 = vmatpush3.msra.mxu0 %v2075_v47 }
 0xcc1   :  { %2548 = vmatprep.subr.mxu0 %v2847_v10 }
 0xcc2   :  { %2549 = vmatpush3.msra.mxu0 %v2074_v41 }
 0xcc3   :  { %2550 = vmatprep.subr.mxu0 %v2847_v10 }
 0xcc4   :  { %2551 = vmatpush3.msra.mxu0 %v2073_v42 }
 0xcc5   :  { %2552 = vmatprep.subr.mxu0 %v2847_v10 }
 0xcc6   :  { %2553 = vmatpush3.msra.mxu0 %v2072_v43 }
 0xcc7   :  { %2554 = vmatprep.subr.mxu0 %v2847_v10 }
 0xcc8   :  { %2555 = vmatpush3.msra.mxu0 %v2071_v44 }
 0xcc9   :  { %2556 = vmatprep.subr.mxu0 %v2847_v10 }
 0xcca   :  { %2557 = vmatpush3.msra.mxu0 %v2070_v45 }
 0xccb   :  { %2558 = vmatprep.subr.mxu0 %v2847_v10 }
 0xccc   :  { %2559 = vmatpush3.msra.mxu0 %v2069_v46 }
 0xd6d   :  { %v1964_v48 = vpop.f32.mrf.mxu0  ;;  %v2057_v50 = vpop.f32.mrf.mxu1 }
 0xd6e   :  { %v2058_v51 = vadd.f32 %v2226_v16, %v2057_v50  ;;  %v1965_v58 = vadd.f32 %v2225_v57, %v1964_v48 }
 0xd6f   :  { %v2492_v52 = vpop.f32.mrf.mxu0  ;;  %v2527_v53 = vpop.f32.mrf.mxu1 }
 0xd70   :  { %v2227_v54 = vmul.f32 -1.442695, %v2058_v51 }
 0xd72   :  { %2620 = vpow2.f32 %v2227_v54 }
 0xd7f   :  { %v2621_v55 = vpop.eup %2620 }
 0xd80   :  { %v2064_v56 = vadd.f32 1.0, %v2621_v55 }
 0xd82   :  { %2622 = vrcp.f32 %v2064_v56 }
 0xd8f   :  { %v2623_v10 = vpop.eup %2622 }
 0xd90   :  { %v2067_v59 = vmul.f32 %v2623_v10, %v2058_v51 }
 0xd92   :  { %v2068_v60 = vmul.f32 %v2067_v59, %v1965_v58 }
 0xd94   :  { %2561 = vmatmul.mubr.f32.vlgmr.msra.gmra.mxu0 %v2068_v60 }
 0xe54   :  { %v2158_v62 = vpop.f32.mrf.mxu0 }
 0xe55   :  { %v2159_v63 = vadd.f32 %v2228_v61, %v2158_v62 }
 0xe56   :  { %v2562_v0 = vpop.f32.mrf.mxu0 }
 0xe57   :  { %v2162_v1 = vadd.f32 %v2159_v63, %v3174_v13 }
 0xe59   :  { %v2164_v2 = vcombine.high %v2162_v1, %v2162_v1  ;;  %2167 = vst.msk [vmem:[#allocation17] sm:$0xf] %vm2166_vm8, %v2162_v1 }
 0xe5b   :  { %2168 = vst.msk [vmem:[#allocation17 + $0x4] sm:$0xf] %vm2166_vm8, %v2164_v2 }
 0xe5c   :  { %2815 = shalt.err (!%p2812_p7)
}
 0xe5d   :  { %s2855_s16 = smov 64   ;;  %s2856_s18 = smov 4  }
 0xe5e   :  { %2180 = dma.vmem_to_hbm [thread:$0]  %s2175_s2, 128, %s3361_s17, [#allocation4], %s2855_s16, %s2855_s16, %s2856_s18  }
 0xe5f   :  { %2834 = dma.done.wait [#allocation4], 128  }
 0xe60   :  { %2835 = vsyncadd [#allocation4], 4294967168 }
 0xe61   :  { %2184 = vsyncpa [#allocation3], 1 }
 0xe62   :  { %2185 = vsyncpa [#allocation6], 1 }
 0xe63   :  { %2186 = vsyncpa [#allocation9], 1 }
 0xe64   :  { %2187 = vsyncpa [#allocation12], 1 }
 0xe65   :  { %2188 = vsyncpa [#allocation15], 1 }
 0xe66   :  { %2189 = vsyncpa [#allocation4], 1 }

</bundles_post_ra>
